<compile_context>
chip_gen: v7x
topology: tpu7x:2x2x1
jax: 0.10.0
libtpu: 0.0.40
codegen_flags: <defaults>
</compile_context>

<pallas_src>
import math

import jax
import jax.numpy as jnp
from jax.experimental import pallas as pl
from jax.experimental.pallas import tpu as pltpu

# ----- config (mirrors args / args.model_args) -------------------------------
B = 2            # batch
T = 8            # period_length (sequence length)
E = 32           # embedding_size
H = 4            # n_heads
HD = E // H      # head dim
L = 2            # n_layers
FF = 2 * E       # dim_feedforward = 2 * embedding_size
P = 16           # projection_size
F = 10           # len(get_features(args))  (synthetic attribute count)
IN_FEAT = 54     # skeleton features per frame (18 joints * 3 coords)
BT = B * T       # batch folded into matmul rows
HBT = H * BT     # heads stacked along sublanes


# ----- math helpers -----------------------------------------------------------
def _layernorm(x, w, b, eps=1e-5):
    mu = jnp.mean(x, axis=-1, keepdims=True)
    xc = x - mu
    var = jnp.mean(xc * xc, axis=-1, keepdims=True)
    return xc * jax.lax.rsqrt(var + eps) * w + b


def _l2norm_ref(x):
    # torch.nn.functional.normalize: x / max(||x||_2, 1e-12)
    return x / jnp.maximum(jnp.sqrt(jnp.sum(x * x, axis=-1, keepdims=True)), 1e-12)


# ----- the Pallas kernel ------------------------------------------------------
def gaitformer_kernel(x_ref, posb_ref, amask_ref, hsel_ref, wsk_ref,
                      ln_ref, wattn_ref, be_ref, wf1_ref, bf1_ref, wf2_ref,
                      whead_ref, bhead_ref, wproj_ref, bproj_ref, out_ref):
    scale = 1.0 / math.sqrt(HD)
    amask = amask_ref[...]          # (H*BT, BT) additive mask (batch block-diag, tiled over heads)
    hsel = hsel_ref[...]            # (H*BT, E)  0/1 head-column selector

    # skeleton_encoding; posb already contains positional embedding + skel bias
    x = x_ref[...].astype(jnp.bfloat16)                    # (BT, 54)
    h = (jnp.dot(x, wsk_ref[...], preferred_element_type=jnp.float32)
         + posb_ref[...])                                  # (BT, E) f32

    for l in range(L):                                     # static layer loop
        lnp = ln_ref[l]                                    # (4, E)  [ln1w, ln1b, ln2w, ln2b]
        be = be_ref[l]                                     # (5, E)  [bq, bk, bv, bao, bff2]
        wa = wattn_ref[l]                                  # (4, E, E) bf16 [wq, wk, wv, wao]

        # --- pre-LN multi-head self-attention (heads stacked along sublanes) ---
        xn = _layernorm(h, lnp[0:1], lnp[1:2]).astype(jnp.bfloat16)
        q = jnp.dot(xn, wa[0], preferred_element_type=jnp.float32) + be[0:1]
        k = jnp.dot(xn, wa[1], preferred_element_type=jnp.float32) + be[1:2]
        v = jnp.dot(xn, wa[2], preferred_element_type=jnp.float32) + be[2:3]

        # Row block hh of Qstack keeps only head hh's feature columns, so one
        # NT matmul against the full K produces all heads' score blocks.
        qs = (jnp.tile(q, (H, 1)) * hsel).astype(jnp.bfloat16)        # (H*BT, E)
        s = jax.lax.dot_general(qs, k.astype(jnp.bfloat16),
                                (((1,), (1,)), ((), ())),
                                preferred_element_type=jnp.float32)   # (H*BT, BT)
        s = s * scale + amask
        m = jnp.max(s, axis=-1, keepdims=True)
        e = jnp.exp(s - m)
        p = e * pl.reciprocal(jnp.sum(e, axis=-1, keepdims=True), approx=True)

        of = jnp.dot(p.astype(jnp.bfloat16), v.astype(jnp.bfloat16),
                     preferred_element_type=jnp.float32) * hsel       # (H*BT, E)
        # Layout-preserving reshape (sublane split, minor dim unchanged) + sum
        # over head blocks == concatenated head output.
        attn = jnp.sum(of.reshape(H, BT, E), axis=0)                  # (BT, E)

        h = h + jnp.dot(attn.astype(jnp.bfloat16), wa[3],
                        preferred_element_type=jnp.float32) + be[3:4]

        # --- feed-forward block (norm_first) ---
        xn2 = _layernorm(h, lnp[2:3], lnp[3:4]).astype(jnp.bfloat16)
        f1 = jax.nn.gelu(jnp.dot(xn2, wf1_ref[l], preferred_element_type=jnp.float32)
                         + bf1_ref[l], approximate=True)              # (BT, FF)
        h = h + jnp.dot(f1.astype(jnp.bfloat16), wf2_ref[l],
                        preferred_element_type=jnp.float32) + be[4:5]

    # --- classifier heads, batched over the B CLS rows ---
    feats = h.reshape(B, T, E)[:, 0, :]                               # (B, E) CLS rows
    fb = feats.astype(jnp.bfloat16)

    # fused [out_embedding | out_appearance] matmul
    r = (jnp.dot(fb, whead_ref[...], preferred_element_type=jnp.float32)
         + bhead_ref[...])                                            # (B, E+F)
    emb = r[:, :E]
    app = jax.nn.sigmoid(r[:, E:])                                    # (B, F)
    rep = emb * jax.lax.rsqrt(jnp.maximum(
        jnp.sum(emb * emb, axis=-1, keepdims=True), 1e-24))

    pr = (jnp.dot(jax.nn.gelu(emb, approximate=True).astype(jnp.bfloat16),
                  wproj_ref[...], preferred_element_type=jnp.float32)
          + bproj_ref[...])                                           # (B, P)
    pr = pr * jax.lax.rsqrt(jnp.maximum(
        jnp.sum(pr * pr, axis=-1, keepdims=True), 1e-24))

    # single fused lane-dense store: [rep | appearance | projection]
    out_ref[...] = jnp.concatenate([rep, app, pr], axis=-1)           # (B, E+F+P)


# ----- parameter construction (deterministic, synthetic) ----------------------
def init_params(key):
    ks = jax.random.split(key, 19)

    def w(k, shape, fan_in):
        return jax.random.normal(k, shape, jnp.float32) / math.sqrt(fan_in)

    p = {}
    p['pos'] = jax.random.normal(ks[0], (T, E), jnp.float32)            # (1, T, E) squeezed
    p['w_skel'] = w(ks[1], (IN_FEAT, E), IN_FEAT)
    p['b_skel'] = 0.1 * jax.random.normal(ks[2], (1, E), jnp.float32)
    # transformer layers (stacked over L)
    p['w_in'] = w(ks[3], (L, E, 3 * E), E)
    p['b_in'] = 0.1 * jax.random.normal(ks[4], (L, 1, 3 * E), jnp.float32)
    p['w_ao'] = w(ks[5], (L, E, E), E)
    p['b_ao'] = 0.1 * jax.random.normal(ks[6], (L, 1, E), jnp.float32)
    p['ln1_w'] = 1.0 + 0.1 * jax.random.normal(ks[7], (L, 1, E), jnp.float32)
    p['ln1_b'] = 0.1 * jax.random.normal(ks[8], (L, 1, E), jnp.float32)
    p['ln2_w'] = 1.0 + 0.1 * jax.random.normal(ks[9], (L, 1, E), jnp.float32)
    p['ln2_b'] = 0.1 * jax.random.normal(ks[10], (L, 1, E), jnp.float32)
    p['w_ff1'] = w(ks[11], (L, E, FF), E)
    p['b_ff1'] = 0.1 * jax.random.normal(ks[12], (L, 1, FF), jnp.float32)
    p['w_ff2'] = w(ks[13], (L, FF, E), FF)
    p['b_ff2'] = 0.1 * jax.random.normal(ks[14], (L, 1, E), jnp.float32)
    # heads
    p['w_emb'] = w(ks[15], (E, E), E)                                   # out_embedding (no bias)
    p['w_app'] = w(ks[16], (E, F), E)
    p['b_app'] = 0.1 * jax.random.normal(ks[17], (1, F), jnp.float32)
    p['w_proj'] = w(ks[18], (E, P), E)
    p['b_proj'] = jnp.zeros((1, P), jnp.float32)
    return p


# ----- one-time packing of weights / constants (hoisted out of the jit path) --
def prepare_packed(params):
    bf = lambda a: a.astype(jnp.bfloat16)

    # positional embedding tiled over batch rows, fused with skeleton bias
    pos_bias = jnp.tile(params['pos'], (B, 1)) + params['b_skel']        # (BT, E) f32

    # batch block-diagonal additive mask, tiled along the head-stacked sublanes
    block = jnp.kron(jnp.eye(B, dtype=jnp.float32), jnp.ones((T, T), jnp.float32))
    mask = (1.0 - block) * jnp.float32(-1e30)                            # (BT, BT)
    attn_bias = jnp.tile(mask, (H, 1))                                   # (H*BT, BT)

    # head-column selector: row block hh keeps only head hh's feature columns
    head_of_col = jnp.arange(E, dtype=jnp.int32) // HD                   # (E,)
    head_of_row = jnp.repeat(jnp.arange(H, dtype=jnp.int32), BT)         # (H*BT,)
    hsel = (head_of_row[:, None] == head_of_col[None, :]).astype(jnp.float32)

    # per-layer weight/bias slabs
    w_in = params['w_in']                                                # (L, E, 3E)
    wq, wk, wv = w_in[..., :E], w_in[..., E:2 * E], w_in[..., 2 * E:]
    w_attn = jnp.stack([wq, wk, wv, params['w_ao']], axis=1)             # (L, 4, E, E)

    b_in = params['b_in'][:, 0, :]                                       # (L, 3E)
    b_e = jnp.stack([b_in[:, :E], b_in[:, E:2 * E], b_in[:, 2 * E:],
                     params['b_ao'][:, 0, :], params['b_ff2'][:, 0, :]], axis=1)  # (L, 5, E)

    ln = jnp.stack([params['ln1_w'][:, 0, :], params['ln1_b'][:, 0, :],
                    params['ln2_w'][:, 0, :], params['ln2_b'][:, 0, :]], axis=1)  # (L, 4, E)

    # fused classifier weights: [out_embedding | out_appearance] share input feats
    w_head = jnp.concatenate([params['w_emb'], params['w_app']], axis=1)  # (E, E+F)
    b_head = jnp.concatenate([jnp.zeros((1, E), jnp.float32), params['b_app']], axis=1)

    return dict(
        pos_bias=pos_bias, attn_bias=attn_bias, hsel=hsel,
        w_skel=bf(params['w_skel']),
        ln=ln, w_attn=bf(w_attn), b_e=b_e,
        w_ff1=bf(params['w_ff1']), b_ff1=params['b_ff1'], w_ff2=bf(params['w_ff2']),
        w_head=bf(w_head), b_head=b_head,
        w_proj=bf(params['w_proj']), b_proj=params['b_proj'],
    )


# ----- wrapper -----------------------------------------------------------------
@jax.jit
def gaitformer_forward(image, packed):
    # image: (B, 3, T, 18, 1) -> (B*T, 54), same permute+reshape as the module.
    x = jnp.transpose(image, (0, 2, 3, 1, 4)).reshape(BT, IN_FEAT)

    args = (x, packed['pos_bias'], packed['attn_bias'], packed['hsel'],
            packed['w_skel'], packed['ln'], packed['w_attn'], packed['b_e'],
            packed['w_ff1'], packed['b_ff1'], packed['w_ff2'],
            packed['w_head'], packed['b_head'], packed['w_proj'], packed['b_proj'])

    in_specs = [pl.BlockSpec(memory_space=pltpu.MemorySpace.VMEM) for _ in args]
    out_specs = pl.BlockSpec(memory_space=pltpu.MemorySpace.VMEM)

    out = pl.pallas_call(
        gaitformer_kernel,
        out_shape=jax.ShapeDtypeStruct((B, E + F + P), jnp.float32),
        in_specs=in_specs,
        out_specs=out_specs,
    )(*args)

    return {'appearance': out[:, E:E + F],
            'representation': out[:, :E],
            'projection': out[:, E + F:]}


# ----- pure-JAX reference (PyTorch semantics: f32, erf-GELU, exact softmax) ----
def reference_forward(image, params):
    x = jnp.transpose(image, (0, 2, 3, 1, 4)).reshape(B, T, IN_FEAT)
    h = x @ params['w_skel'] + params['b_skel'] + params['pos']
    for l in range(L):
        xn = _layernorm(h, params['ln1_w'][l], params['ln1_b'][l])
        qkv = xn @ params['w_in'][l] + params['b_in'][l]
        q, k, v = qkv[..., :E], qkv[..., E:2 * E], qkv[..., 2 * E:]
        qh = q.reshape(B, T, H, HD).transpose(0, 2, 1, 3)
        kh = k.reshape(B, T, H, HD).transpose(0, 2, 1, 3)
        vh = v.reshape(B, T, H, HD).transpose(0, 2, 1, 3)
        s = jnp.einsum('bhqd,bhkd->bhqk', qh, kh) / math.sqrt(HD)
        pr = jax.nn.softmax(s, axis=-1)
        o = jnp.einsum('bhqk,bhkd->bhqd', pr, vh).transpose(0, 2, 1, 3).reshape(B, T, E)
        h = h + o @ params['w_ao'][l] + params['b_ao'][l]
        xn2 = _layernorm(h, params['ln2_w'][l], params['ln2_b'][l])
        f = jax.nn.gelu(xn2 @ params['w_ff1'][l] + params['b_ff1'][l], approximate=False)
        h = h + f @ params['w_ff2'][l] + params['b_ff2'][l]
    feats = h[:, 0]
    emb = feats @ params['w_emb']
    app = jax.nn.sigmoid(feats @ params['w_app'] + params['b_app'])
    proj = _l2norm_ref(jax.nn.gelu(emb, approximate=False) @ params['w_proj']
                       + params['b_proj'])
    return {'appearance': app, 'representation': _l2norm_ref(emb), 'projection': proj}


if __name__ == "__main__":
    key = jax.random.PRNGKey(0)
    pkey, xkey = jax.random.split(key)
    params = init_params(pkey)
    packed = prepare_packed(params)          # built once, outside the jitted path
    image = jax.random.normal(xkey, (B, 3, T, 18, 1), jnp.float32)

    out = gaitformer_forward(image, packed)
    jax.block_until_ready(out)

    ref = reference_forward(image, params)
    for name in ('appearance', 'representation', 'projection'):
        assert out[name].shape == ref[name].shape, name
        assert jnp.allclose(out[name], ref[name], atol=5e-2, rtol=5e-2), name

    print("KERNEL_OK")
</pallas_src>

<mosaic_0001>
module attributes {stable_mosaic.version = 11 : i64} {
  func.func @gaitformer_kernel(%arg0: memref<16x54xf32, #tpu.memory_space<vmem>>, %arg1: memref<16x32xf32, #tpu.memory_space<vmem>>, %arg2: memref<64x16xf32, #tpu.memory_space<vmem>>, %arg3: memref<64x32xf32, #tpu.memory_space<vmem>>, %arg4: memref<54x32xbf16, #tpu.memory_space<vmem>>, %arg5: memref<2x4x32xf32, #tpu.memory_space<vmem>>, %arg6: memref<2x4x32x32xbf16, #tpu.memory_space<vmem>>, %arg7: memref<2x5x32xf32, #tpu.memory_space<vmem>>, %arg8: memref<2x32x64xbf16, #tpu.memory_space<vmem>>, %arg9: memref<2x1x64xf32, #tpu.memory_space<vmem>>, %arg10: memref<2x64x32xbf16, #tpu.memory_space<vmem>>, %arg11: memref<32x42xbf16, #tpu.memory_space<vmem>>, %arg12: memref<1x42xf32, #tpu.memory_space<vmem>>, %arg13: memref<32x16xbf16, #tpu.memory_space<vmem>>, %arg14: memref<1x16xf32, #tpu.memory_space<vmem>>, %arg15: memref<2x58xf32, #tpu.memory_space<vmem>>) attributes {dimension_semantics = [], scalar_prefetch = 0 : i64, scratch_operands = 0 : i64, tpu.core_type = #tpu.core_type<tc>} {
    %c0 = arith.constant 0 : index
    %c0_0 = arith.constant 0 : index
    %0 = vector.load %arg2[%c0, %c0_0] : memref<64x16xf32, #tpu.memory_space<vmem>>, vector<64x16xf32>
    %c0_1 = arith.constant 0 : index
    %c0_2 = arith.constant 0 : index
    %1 = vector.load %arg3[%c0_1, %c0_2] : memref<64x32xf32, #tpu.memory_space<vmem>>, vector<64x32xf32>
    %c0_3 = arith.constant 0 : index
    %c0_4 = arith.constant 0 : index
    %2 = vector.load %arg0[%c0_3, %c0_4] : memref<16x54xf32, #tpu.memory_space<vmem>>, vector<16x54xf32>
    %3 = arith.truncf %2 : vector<16x54xf32> to vector<16x54xbf16>
    %c0_5 = arith.constant 0 : index
    %c0_6 = arith.constant 0 : index
    %4 = vector.load %arg4[%c0_5, %c0_6] : memref<54x32xbf16, #tpu.memory_space<vmem>>, vector<54x32xbf16>
    %cst = arith.constant dense<0.000000e+00> : vector<16x32xf32>
    %5 = tpu.matmul %3, %4, %cst {dimension_numbers = #tpu.dot_dimension_numbers<[1], [0], [0], [1], [0, 0, 1, 1], [], []>} : vector<16x54xbf16>, vector<54x32xbf16>, vector<16x32xf32> -> vector<16x32xf32>
    %c0_7 = arith.constant 0 : index
    %c0_8 = arith.constant 0 : index
    %6 = vector.load %arg1[%c0_7, %c0_8] : memref<16x32xf32, #tpu.memory_space<vmem>>, vector<16x32xf32>
    %7 = arith.addf %5, %6 : vector<16x32xf32>
    %c0_9 = arith.constant 0 : index
    %c0_10 = arith.constant 0 : index
    %c0_11 = arith.constant 0 : index
    %8 = vector.load %arg5[%c0_9, %c0_10, %c0_11] : memref<2x4x32xf32, #tpu.memory_space<vmem>>, vector<1x4x32xf32>
    %9 = vector.shape_cast %8 : vector<1x4x32xf32> to vector<4x32xf32>
    %c0_12 = arith.constant 0 : index
    %c0_13 = arith.constant 0 : index
    %c0_14 = arith.constant 0 : index
    %10 = vector.load %arg7[%c0_12, %c0_13, %c0_14] : memref<2x5x32xf32, #tpu.memory_space<vmem>>, vector<1x5x32xf32>
    %11 = vector.shape_cast %10 : vector<1x5x32xf32> to vector<5x32xf32>
    %c0_15 = arith.constant 0 : index
    %c0_16 = arith.constant 0 : index
    %c0_17 = arith.constant 0 : index
    %c0_18 = arith.constant 0 : index
    %12 = vector.load %arg6[%c0_15, %c0_16, %c0_17, %c0_18] : memref<2x4x32x32xbf16, #tpu.memory_space<vmem>>, vector<1x4x32x32xbf16>
    %13 = vector.shape_cast %12 : vector<1x4x32x32xbf16> to vector<4x32x32xbf16>
    %14 = vector.extract_strided_slice %9 {offsets = [0, 0], sizes = [1, 32], strides = [1, 1]} : vector<4x32xf32> to vector<1x32xf32>
    %15 = vector.extract_strided_slice %9 {offsets = [1, 0], sizes = [1, 32], strides = [1, 1]} : vector<4x32xf32> to vector<1x32xf32>
    %cst_19 = arith.constant dense<0.000000e+00> : vector<16xf32>
    %16 = vector.multi_reduction <add>, %7, %cst_19 [1] : vector<16x32xf32> to vector<16xf32>
    %17 = vector.shape_cast %16 : vector<16xf32> to vector<16x1xf32>
    %cst_20 = arith.constant 3.200000e+01 : f32
    %18 = vector.broadcast %cst_20 : f32 to vector<16x1xf32>
    %19 = arith.divf %17, %18 : vector<16x1xf32>
    %20 = vector.broadcast %19 : vector<16x1xf32> to vector<16x32xf32>
    %21 = arith.subf %7, %20 : vector<16x32xf32>
    %22 = arith.mulf %21, %21 : vector<16x32xf32>
    %cst_21 = arith.constant dense<0.000000e+00> : vector<16xf32>
    %23 = vector.multi_reduction <add>, %22, %cst_21 [1] : vector<16x32xf32> to vector<16xf32>
    %24 = vector.shape_cast %23 : vector<16xf32> to vector<16x1xf32>
    %cst_22 = arith.constant 3.200000e+01 : f32
    %25 = vector.broadcast %cst_22 : f32 to vector<16x1xf32>
    %26 = arith.divf %24, %25 : vector<16x1xf32>
    %cst_23 = arith.constant 9.99999974E-6 : f32
    %27 = vector.broadcast %cst_23 : f32 to vector<16x1xf32>
    %28 = arith.addf %26, %27 : vector<16x1xf32>
    %29 = math.rsqrt %28 : vector<16x1xf32>
    %30 = vector.broadcast %29 : vector<16x1xf32> to vector<16x32xf32>
    %31 = arith.mulf %21, %30 : vector<16x32xf32>
    %32 = vector.broadcast %14 : vector<1x32xf32> to vector<16x32xf32>
    %33 = arith.mulf %31, %32 : vector<16x32xf32>
    %34 = vector.broadcast %15 : vector<1x32xf32> to vector<16x32xf32>
    %35 = arith.addf %33, %34 : vector<16x32xf32>
    %36 = arith.truncf %35 : vector<16x32xf32> to vector<16x32xbf16>
    %37 = vector.extract_strided_slice %13 {offsets = [0, 0, 0], sizes = [1, 32, 32], strides = [1, 1, 1]} : vector<4x32x32xbf16> to vector<1x32x32xbf16>
    %38 = vector.shape_cast %37 : vector<1x32x32xbf16> to vector<32x32xbf16>
    %cst_24 = arith.constant dense<0.000000e+00> : vector<16x32xf32>
    %39 = tpu.matmul %36, %38, %cst_24 {dimension_numbers = #tpu.dot_dimension_numbers<[1], [0], [0], [1], [0, 0, 1, 1], [], []>} : vector<16x32xbf16>, vector<32x32xbf16>, vector<16x32xf32> -> vector<16x32xf32>
    %40 = vector.extract_strided_slice %11 {offsets = [0, 0], sizes = [1, 32], strides = [1, 1]} : vector<5x32xf32> to vector<1x32xf32>
    %41 = vector.broadcast %40 : vector<1x32xf32> to vector<16x32xf32>
    %42 = arith.addf %39, %41 : vector<16x32xf32>
    %43 = vector.extract_strided_slice %13 {offsets = [1, 0, 0], sizes = [1, 32, 32], strides = [1, 1, 1]} : vector<4x32x32xbf16> to vector<1x32x32xbf16>
    %44 = vector.shape_cast %43 : vector<1x32x32xbf16> to vector<32x32xbf16>
    %cst_25 = arith.constant dense<0.000000e+00> : vector<16x32xf32>
    %45 = tpu.matmul %36, %44, %cst_25 {dimension_numbers = #tpu.dot_dimension_numbers<[1], [0], [0], [1], [0, 0, 1, 1], [], []>} : vector<16x32xbf16>, vector<32x32xbf16>, vector<16x32xf32> -> vector<16x32xf32>
    %46 = vector.extract_strided_slice %11 {offsets = [1, 0], sizes = [1, 32], strides = [1, 1]} : vector<5x32xf32> to vector<1x32xf32>
    %47 = vector.broadcast %46 : vector<1x32xf32> to vector<16x32xf32>
    %48 = arith.addf %45, %47 : vector<16x32xf32>
    %49 = vector.extract_strided_slice %13 {offsets = [2, 0, 0], sizes = [1, 32, 32], strides = [1, 1, 1]} : vector<4x32x32xbf16> to vector<1x32x32xbf16>
    %50 = vector.shape_cast %49 : vector<1x32x32xbf16> to vector<32x32xbf16>
    %cst_26 = arith.constant dense<0.000000e+00> : vector<16x32xf32>
    %51 = tpu.matmul %36, %50, %cst_26 {dimension_numbers = #tpu.dot_dimension_numbers<[1], [0], [0], [1], [0, 0, 1, 1], [], []>} : vector<16x32xbf16>, vector<32x32xbf16>, vector<16x32xf32> -> vector<16x32xf32>
    %52 = vector.extract_strided_slice %11 {offsets = [2, 0], sizes = [1, 32], strides = [1, 1]} : vector<5x32xf32> to vector<1x32xf32>
    %53 = vector.broadcast %52 : vector<1x32xf32> to vector<16x32xf32>
    %54 = arith.addf %51, %53 : vector<16x32xf32>
    %55 = tpu.concatenate %42, %42, %42, %42 in 0 : vector<16x32xf32>, vector<16x32xf32>, vector<16x32xf32>, vector<16x32xf32> -> vector<64x32xf32>
    %56 = arith.mulf %55, %1 : vector<64x32xf32>
    %57 = arith.truncf %56 : vector<64x32xf32> to vector<64x32xbf16>
    %58 = arith.truncf %48 : vector<16x32xf32> to vector<16x32xbf16>
    %cst_27 = arith.constant dense<0.000000e+00> : vector<64x16xf32>
    %59 = tpu.matmul %57, %58, %cst_27 {dimension_numbers = #tpu.dot_dimension_numbers<[1], [1], [0], [0], [0, 0, 1, 0], [], []>} : vector<64x32xbf16>, vector<16x32xbf16>, vector<64x16xf32> -> vector<64x16xf32>
    %cst_28 = arith.constant 0.353553385 : f32
    %60 = vector.broadcast %cst_28 : f32 to vector<64x16xf32>
    %61 = arith.mulf %59, %60 : vector<64x16xf32>
    %62 = arith.addf %61, %0 : vector<64x16xf32>
    %cst_29 = arith.constant dense<0xFF800000> : vector<64xf32>
    %63 = vector.multi_reduction <maximumf>, %62, %cst_29 [1] : vector<64x16xf32> to vector<64xf32>
    %64 = vector.shape_cast %63 : vector<64xf32> to vector<64x1xf32>
    %65 = vector.broadcast %64 : vector<64x1xf32> to vector<64x16xf32>
    %66 = arith.subf %62, %65 : vector<64x16xf32>
    %67 = math.exp %66 : vector<64x16xf32>
    %cst_30 = arith.constant dense<0.000000e+00> : vector<64xf32>
    %68 = vector.multi_reduction <add>, %67, %cst_30 [1] : vector<64x16xf32> to vector<64xf32>
    %69 = vector.shape_cast %68 : vector<64xf32> to vector<64x1xf32>
    %70 = tpu.reciprocal %69 {approx = true} : vector<64x1xf32> -> vector<64x1xf32>
    %71 = vector.broadcast %70 : vector<64x1xf32> to vector<64x16xf32>
    %72 = arith.mulf %67, %71 : vector<64x16xf32>
    %73 = arith.truncf %72 : vector<64x16xf32> to vector<64x16xbf16>
    %74 = arith.truncf %54 : vector<16x32xf32> to vector<16x32xbf16>
    %cst_31 = arith.constant dense<0.000000e+00> : vector<64x32xf32>
    %75 = tpu.matmul %73, %74, %cst_31 {dimension_numbers = #tpu.dot_dimension_numbers<[1], [0], [0], [1], [0, 0, 1, 1], [], []>} : vector<64x16xbf16>, vector<16x32xbf16>, vector<64x32xf32> -> vector<64x32xf32>
    %76 = arith.mulf %75, %1 : vector<64x32xf32>
    %77 = vector.shape_cast %76 : vector<64x32xf32> to vector<4x16x32xf32>
    %cst_32 = arith.constant dense<0.000000e+00> : vector<16x32xf32>
    %78 = vector.multi_reduction <add>, %77, %cst_32 [0] : vector<4x16x32xf32> to vector<16x32xf32>
    %79 = arith.truncf %78 : vector<16x32xf32> to vector<16x32xbf16>
    %80 = vector.extract_strided_slice %13 {offsets = [3, 0, 0], sizes = [1, 32, 32], strides = [1, 1, 1]} : vector<4x32x32xbf16> to vector<1x32x32xbf16>
    %81 = vector.shape_cast %80 : vector<1x32x32xbf16> to vector<32x32xbf16>
    %cst_33 = arith.constant dense<0.000000e+00> : vector<16x32xf32>
    %82 = tpu.matmul %79, %81, %cst_33 {dimension_numbers = #tpu.dot_dimension_numbers<[1], [0], [0], [1], [0, 0, 1, 1], [], []>} : vector<16x32xbf16>, vector<32x32xbf16>, vector<16x32xf32> -> vector<16x32xf32>
    %83 = arith.addf %7, %82 : vector<16x32xf32>
    %84 = vector.extract_strided_slice %11 {offsets = [3, 0], sizes = [1, 32], strides = [1, 1]} : vector<5x32xf32> to vector<1x32xf32>
    %85 = vector.broadcast %84 : vector<1x32xf32> to vector<16x32xf32>
    %86 = arith.addf %83, %85 : vector<16x32xf32>
    %87 = vector.extract_strided_slice %9 {offsets = [2, 0], sizes = [1, 32], strides = [1, 1]} : vector<4x32xf32> to vector<1x32xf32>
    %88 = vector.extract_strided_slice %9 {offsets = [3, 0], sizes = [1, 32], strides = [1, 1]} : vector<4x32xf32> to vector<1x32xf32>
    %cst_34 = arith.constant dense<0.000000e+00> : vector<16xf32>
    %89 = vector.multi_reduction <add>, %86, %cst_34 [1] : vector<16x32xf32> to vector<16xf32>
    %90 = vector.shape_cast %89 : vector<16xf32> to vector<16x1xf32>
    %cst_35 = arith.constant 3.200000e+01 : f32
    %91 = vector.broadcast %cst_35 : f32 to vector<16x1xf32>
    %92 = arith.divf %90, %91 : vector<16x1xf32>
    %93 = vector.broadcast %92 : vector<16x1xf32> to vector<16x32xf32>
    %94 = arith.subf %86, %93 : vector<16x32xf32>
    %95 = arith.mulf %94, %94 : vector<16x32xf32>
    %cst_36 = arith.constant dense<0.000000e+00> : vector<16xf32>
    %96 = vector.multi_reduction <add>, %95, %cst_36 [1] : vector<16x32xf32> to vector<16xf32>
    %97 = vector.shape_cast %96 : vector<16xf32> to vector<16x1xf32>
    %cst_37 = arith.constant 3.200000e+01 : f32
    %98 = vector.broadcast %cst_37 : f32 to vector<16x1xf32>
    %99 = arith.divf %97, %98 : vector<16x1xf32>
    %cst_38 = arith.constant 9.99999974E-6 : f32
    %100 = vector.broadcast %cst_38 : f32 to vector<16x1xf32>
    %101 = arith.addf %99, %100 : vector<16x1xf32>
    %102 = math.rsqrt %101 : vector<16x1xf32>
    %103 = vector.broadcast %102 : vector<16x1xf32> to vector<16x32xf32>
    %104 = arith.mulf %94, %103 : vector<16x32xf32>
    %105 = vector.broadcast %87 : vector<1x32xf32> to vector<16x32xf32>
    %106 = arith.mulf %104, %105 : vector<16x32xf32>
    %107 = vector.broadcast %88 : vector<1x32xf32> to vector<16x32xf32>
    %108 = arith.addf %106, %107 : vector<16x32xf32>
    %109 = arith.truncf %108 : vector<16x32xf32> to vector<16x32xbf16>
    %c0_39 = arith.constant 0 : index
    %c0_40 = arith.constant 0 : index
    %c0_41 = arith.constant 0 : index
    %110 = vector.load %arg8[%c0_39, %c0_40, %c0_41] : memref<2x32x64xbf16, #tpu.memory_space<vmem>>, vector<1x32x64xbf16>
    %111 = vector.shape_cast %110 : vector<1x32x64xbf16> to vector<32x64xbf16>
    %cst_42 = arith.constant dense<0.000000e+00> : vector<16x64xf32>
    %112 = tpu.matmul %109, %111, %cst_42 {dimension_numbers = #tpu.dot_dimension_numbers<[1], [0], [0], [1], [0, 0, 1, 1], [], []>} : vector<16x32xbf16>, vector<32x64xbf16>, vector<16x64xf32> -> vector<16x64xf32>
    %c0_43 = arith.constant 0 : index
    %c0_44 = arith.constant 0 : index
    %c0_45 = arith.constant 0 : index
    %113 = vector.load %arg9[%c0_43, %c0_44, %c0_45] : memref<2x1x64xf32, #tpu.memory_space<vmem>>, vector<1x1x64xf32>
    %114 = vector.shape_cast %113 : vector<1x1x64xf32> to vector<1x64xf32>
    %115 = vector.broadcast %114 : vector<1x64xf32> to vector<16x64xf32>
    %116 = arith.addf %112, %115 : vector<16x64xf32>
    %117 = arith.mulf %116, %116 : vector<16x64xf32>
    %118 = arith.mulf %116, %117 : vector<16x64xf32>
    %cst_46 = arith.constant 4.471500e-02 : f32
    %119 = vector.broadcast %cst_46 : f32 to vector<16x64xf32>
    %120 = arith.mulf %119, %118 : vector<16x64xf32>
    %121 = arith.addf %116, %120 : vector<16x64xf32>
    %cst_47 = arith.constant 0.797884583 : f32
    %122 = vector.broadcast %cst_47 : f32 to vector<16x64xf32>
    %123 = arith.mulf %122, %121 : vector<16x64xf32>
    %124 = math.tanh %123 : vector<16x64xf32>
    %cst_48 = arith.constant 1.000000e+00 : f32
    %125 = vector.broadcast %cst_48 : f32 to vector<16x64xf32>
    %126 = arith.addf %125, %124 : vector<16x64xf32>
    %cst_49 = arith.constant 5.000000e-01 : f32
    %127 = vector.broadcast %cst_49 : f32 to vector<16x64xf32>
    %128 = arith.mulf %127, %126 : vector<16x64xf32>
    %129 = arith.mulf %116, %128 : vector<16x64xf32>
    %130 = arith.truncf %129 : vector<16x64xf32> to vector<16x64xbf16>
    %c0_50 = arith.constant 0 : index
    %c0_51 = arith.constant 0 : index
    %c0_52 = arith.constant 0 : index
    %131 = vector.load %arg10[%c0_50, %c0_51, %c0_52] : memref<2x64x32xbf16, #tpu.memory_space<vmem>>, vector<1x64x32xbf16>
    %132 = vector.shape_cast %131 : vector<1x64x32xbf16> to vector<64x32xbf16>
    %cst_53 = arith.constant dense<0.000000e+00> : vector<16x32xf32>
    %133 = tpu.matmul %130, %132, %cst_53 {dimension_numbers = #tpu.dot_dimension_numbers<[1], [0], [0], [1], [0, 0, 1, 1], [], []>} : vector<16x64xbf16>, vector<64x32xbf16>, vector<16x32xf32> -> vector<16x32xf32>
    %134 = arith.addf %86, %133 : vector<16x32xf32>
    %135 = vector.extract_strided_slice %11 {offsets = [4, 0], sizes = [1, 32], strides = [1, 1]} : vector<5x32xf32> to vector<1x32xf32>
    %136 = vector.broadcast %135 : vector<1x32xf32> to vector<16x32xf32>
    %137 = arith.addf %134, %136 : vector<16x32xf32>
    %c1 = arith.constant 1 : index
    %c0_54 = arith.constant 0 : index
    %c0_55 = arith.constant 0 : index
    %138 = vector.load %arg5[%c1, %c0_54, %c0_55] : memref<2x4x32xf32, #tpu.memory_space<vmem>>, vector<1x4x32xf32>
    %139 = vector.shape_cast %138 : vector<1x4x32xf32> to vector<4x32xf32>
    %c1_56 = arith.constant 1 : index
    %c0_57 = arith.constant 0 : index
    %c0_58 = arith.constant 0 : index
    %140 = vector.load %arg7[%c1_56, %c0_57, %c0_58] : memref<2x5x32xf32, #tpu.memory_space<vmem>>, vector<1x5x32xf32>
    %141 = vector.shape_cast %140 : vector<1x5x32xf32> to vector<5x32xf32>
    %c1_59 = arith.constant 1 : index
    %c0_60 = arith.constant 0 : index
    %c0_61 = arith.constant 0 : index
    %c0_62 = arith.constant 0 : index
    %142 = vector.load %arg6[%c1_59, %c0_60, %c0_61, %c0_62] : memref<2x4x32x32xbf16, #tpu.memory_space<vmem>>, vector<1x4x32x32xbf16>
    %143 = vector.shape_cast %142 : vector<1x4x32x32xbf16> to vector<4x32x32xbf16>
    %144 = vector.extract_strided_slice %139 {offsets = [0, 0], sizes = [1, 32], strides = [1, 1]} : vector<4x32xf32> to vector<1x32xf32>
    %145 = vector.extract_strided_slice %139 {offsets = [1, 0], sizes = [1, 32], strides = [1, 1]} : vector<4x32xf32> to vector<1x32xf32>
    %cst_63 = arith.constant dense<0.000000e+00> : vector<16xf32>
    %146 = vector.multi_reduction <add>, %137, %cst_63 [1] : vector<16x32xf32> to vector<16xf32>
    %147 = vector.shape_cast %146 : vector<16xf32> to vector<16x1xf32>
    %cst_64 = arith.constant 3.200000e+01 : f32
    %148 = vector.broadcast %cst_64 : f32 to vector<16x1xf32>
    %149 = arith.divf %147, %148 : vector<16x1xf32>
    %150 = vector.broadcast %149 : vector<16x1xf32> to vector<16x32xf32>
    %151 = arith.subf %137, %150 : vector<16x32xf32>
    %152 = arith.mulf %151, %151 : vector<16x32xf32>
    %cst_65 = arith.constant dense<0.000000e+00> : vector<16xf32>
    %153 = vector.multi_reduction <add>, %152, %cst_65 [1] : vector<16x32xf32> to vector<16xf32>
    %154 = vector.shape_cast %153 : vector<16xf32> to vector<16x1xf32>
    %cst_66 = arith.constant 3.200000e+01 : f32
    %155 = vector.broadcast %cst_66 : f32 to vector<16x1xf32>
    %156 = arith.divf %154, %155 : vector<16x1xf32>
    %cst_67 = arith.constant 9.99999974E-6 : f32
    %157 = vector.broadcast %cst_67 : f32 to vector<16x1xf32>
    %158 = arith.addf %156, %157 : vector<16x1xf32>
    %159 = math.rsqrt %158 : vector<16x1xf32>
    %160 = vector.broadcast %159 : vector<16x1xf32> to vector<16x32xf32>
    %161 = arith.mulf %151, %160 : vector<16x32xf32>
    %162 = vector.broadcast %144 : vector<1x32xf32> to vector<16x32xf32>
    %163 = arith.mulf %161, %162 : vector<16x32xf32>
    %164 = vector.broadcast %145 : vector<1x32xf32> to vector<16x32xf32>
    %165 = arith.addf %163, %164 : vector<16x32xf32>
    %166 = arith.truncf %165 : vector<16x32xf32> to vector<16x32xbf16>
    %167 = vector.extract_strided_slice %143 {offsets = [0, 0, 0], sizes = [1, 32, 32], strides = [1, 1, 1]} : vector<4x32x32xbf16> to vector<1x32x32xbf16>
    %168 = vector.shape_cast %167 : vector<1x32x32xbf16> to vector<32x32xbf16>
    %cst_68 = arith.constant dense<0.000000e+00> : vector<16x32xf32>
    %169 = tpu.matmul %166, %168, %cst_68 {dimension_numbers = #tpu.dot_dimension_numbers<[1], [0], [0], [1], [0, 0, 1, 1], [], []>} : vector<16x32xbf16>, vector<32x32xbf16>, vector<16x32xf32> -> vector<16x32xf32>
    %170 = vector.extract_strided_slice %141 {offsets = [0, 0], sizes = [1, 32], strides = [1, 1]} : vector<5x32xf32> to vector<1x32xf32>
    %171 = vector.broadcast %170 : vector<1x32xf32> to vector<16x32xf32>
    %172 = arith.addf %169, %171 : vector<16x32xf32>
    %173 = vector.extract_strided_slice %143 {offsets = [1, 0, 0], sizes = [1, 32, 32], strides = [1, 1, 1]} : vector<4x32x32xbf16> to vector<1x32x32xbf16>
    %174 = vector.shape_cast %173 : vector<1x32x32xbf16> to vector<32x32xbf16>
    %cst_69 = arith.constant dense<0.000000e+00> : vector<16x32xf32>
    %175 = tpu.matmul %166, %174, %cst_69 {dimension_numbers = #tpu.dot_dimension_numbers<[1], [0], [0], [1], [0, 0, 1, 1], [], []>} : vector<16x32xbf16>, vector<32x32xbf16>, vector<16x32xf32> -> vector<16x32xf32>
    %176 = vector.extract_strided_slice %141 {offsets = [1, 0], sizes = [1, 32], strides = [1, 1]} : vector<5x32xf32> to vector<1x32xf32>
    %177 = vector.broadcast %176 : vector<1x32xf32> to vector<16x32xf32>
    %178 = arith.addf %175, %177 : vector<16x32xf32>
    %179 = vector.extract_strided_slice %143 {offsets = [2, 0, 0], sizes = [1, 32, 32], strides = [1, 1, 1]} : vector<4x32x32xbf16> to vector<1x32x32xbf16>
    %180 = vector.shape_cast %179 : vector<1x32x32xbf16> to vector<32x32xbf16>
    %cst_70 = arith.constant dense<0.000000e+00> : vector<16x32xf32>
    %181 = tpu.matmul %166, %180, %cst_70 {dimension_numbers = #tpu.dot_dimension_numbers<[1], [0], [0], [1], [0, 0, 1, 1], [], []>} : vector<16x32xbf16>, vector<32x32xbf16>, vector<16x32xf32> -> vector<16x32xf32>
    %182 = vector.extract_strided_slice %141 {offsets = [2, 0], sizes = [1, 32], strides = [1, 1]} : vector<5x32xf32> to vector<1x32xf32>
    %183 = vector.broadcast %182 : vector<1x32xf32> to vector<16x32xf32>
    %184 = arith.addf %181, %183 : vector<16x32xf32>
    %185 = tpu.concatenate %172, %172, %172, %172 in 0 : vector<16x32xf32>, vector<16x32xf32>, vector<16x32xf32>, vector<16x32xf32> -> vector<64x32xf32>
    %186 = arith.mulf %185, %1 : vector<64x32xf32>
    %187 = arith.truncf %186 : vector<64x32xf32> to vector<64x32xbf16>
    %188 = arith.truncf %178 : vector<16x32xf32> to vector<16x32xbf16>
    %cst_71 = arith.constant dense<0.000000e+00> : vector<64x16xf32>
    %189 = tpu.matmul %187, %188, %cst_71 {dimension_numbers = #tpu.dot_dimension_numbers<[1], [1], [0], [0], [0, 0, 1, 0], [], []>} : vector<64x32xbf16>, vector<16x32xbf16>, vector<64x16xf32> -> vector<64x16xf32>
    %cst_72 = arith.constant 0.353553385 : f32
    %190 = vector.broadcast %cst_72 : f32 to vector<64x16xf32>
    %191 = arith.mulf %189, %190 : vector<64x16xf32>
    %192 = arith.addf %191, %0 : vector<64x16xf32>
    %cst_73 = arith.constant dense<0xFF800000> : vector<64xf32>
    %193 = vector.multi_reduction <maximumf>, %192, %cst_73 [1] : vector<64x16xf32> to vector<64xf32>
    %194 = vector.shape_cast %193 : vector<64xf32> to vector<64x1xf32>
    %195 = vector.broadcast %194 : vector<64x1xf32> to vector<64x16xf32>
    %196 = arith.subf %192, %195 : vector<64x16xf32>
    %197 = math.exp %196 : vector<64x16xf32>
    %cst_74 = arith.constant dense<0.000000e+00> : vector<64xf32>
    %198 = vector.multi_reduction <add>, %197, %cst_74 [1] : vector<64x16xf32> to vector<64xf32>
    %199 = vector.shape_cast %198 : vector<64xf32> to vector<64x1xf32>
    %200 = tpu.reciprocal %199 {approx = true} : vector<64x1xf32> -> vector<64x1xf32>
    %201 = vector.broadcast %200 : vector<64x1xf32> to vector<64x16xf32>
    %202 = arith.mulf %197, %201 : vector<64x16xf32>
    %203 = arith.truncf %202 : vector<64x16xf32> to vector<64x16xbf16>
    %204 = arith.truncf %184 : vector<16x32xf32> to vector<16x32xbf16>
    %cst_75 = arith.constant dense<0.000000e+00> : vector<64x32xf32>
    %205 = tpu.matmul %203, %204, %cst_75 {dimension_numbers = #tpu.dot_dimension_numbers<[1], [0], [0], [1], [0, 0, 1, 1], [], []>} : vector<64x16xbf16>, vector<16x32xbf16>, vector<64x32xf32> -> vector<64x32xf32>
    %206 = arith.mulf %205, %1 : vector<64x32xf32>
    %207 = vector.shape_cast %206 : vector<64x32xf32> to vector<4x16x32xf32>
    %cst_76 = arith.constant dense<0.000000e+00> : vector<16x32xf32>
    %208 = vector.multi_reduction <add>, %207, %cst_76 [0] : vector<4x16x32xf32> to vector<16x32xf32>
    %209 = arith.truncf %208 : vector<16x32xf32> to vector<16x32xbf16>
    %210 = vector.extract_strided_slice %143 {offsets = [3, 0, 0], sizes = [1, 32, 32], strides = [1, 1, 1]} : vector<4x32x32xbf16> to vector<1x32x32xbf16>
    %211 = vector.shape_cast %210 : vector<1x32x32xbf16> to vector<32x32xbf16>
    %cst_77 = arith.constant dense<0.000000e+00> : vector<16x32xf32>
    %212 = tpu.matmul %209, %211, %cst_77 {dimension_numbers = #tpu.dot_dimension_numbers<[1], [0], [0], [1], [0, 0, 1, 1], [], []>} : vector<16x32xbf16>, vector<32x32xbf16>, vector<16x32xf32> -> vector<16x32xf32>
    %213 = arith.addf %137, %212 : vector<16x32xf32>
    %214 = vector.extract_strided_slice %141 {offsets = [3, 0], sizes = [1, 32], strides = [1, 1]} : vector<5x32xf32> to vector<1x32xf32>
    %215 = vector.broadcast %214 : vector<1x32xf32> to vector<16x32xf32>
    %216 = arith.addf %213, %215 : vector<16x32xf32>
    %217 = vector.extract_strided_slice %139 {offsets = [2, 0], sizes = [1, 32], strides = [1, 1]} : vector<4x32xf32> to vector<1x32xf32>
    %218 = vector.extract_strided_slice %139 {offsets = [3, 0], sizes = [1, 32], strides = [1, 1]} : vector<4x32xf32> to vector<1x32xf32>
    %cst_78 = arith.constant dense<0.000000e+00> : vector<16xf32>
    %219 = vector.multi_reduction <add>, %216, %cst_78 [1] : vector<16x32xf32> to vector<16xf32>
    %220 = vector.shape_cast %219 : vector<16xf32> to vector<16x1xf32>
    %cst_79 = arith.constant 3.200000e+01 : f32
    %221 = vector.broadcast %cst_79 : f32 to vector<16x1xf32>
    %222 = arith.divf %220, %221 : vector<16x1xf32>
    %223 = vector.broadcast %222 : vector<16x1xf32> to vector<16x32xf32>
    %224 = arith.subf %216, %223 : vector<16x32xf32>
    %225 = arith.mulf %224, %224 : vector<16x32xf32>
    %cst_80 = arith.constant dense<0.000000e+00> : vector<16xf32>
    %226 = vector.multi_reduction <add>, %225, %cst_80 [1] : vector<16x32xf32> to vector<16xf32>
    %227 = vector.shape_cast %226 : vector<16xf32> to vector<16x1xf32>
    %cst_81 = arith.constant 3.200000e+01 : f32
    %228 = vector.broadcast %cst_81 : f32 to vector<16x1xf32>
    %229 = arith.divf %227, %228 : vector<16x1xf32>
    %cst_82 = arith.constant 9.99999974E-6 : f32
    %230 = vector.broadcast %cst_82 : f32 to vector<16x1xf32>
    %231 = arith.addf %229, %230 : vector<16x1xf32>
    %232 = math.rsqrt %231 : vector<16x1xf32>
    %233 = vector.broadcast %232 : vector<16x1xf32> to vector<16x32xf32>
    %234 = arith.mulf %224, %233 : vector<16x32xf32>
    %235 = vector.broadcast %217 : vector<1x32xf32> to vector<16x32xf32>
    %236 = arith.mulf %234, %235 : vector<16x32xf32>
    %237 = vector.broadcast %218 : vector<1x32xf32> to vector<16x32xf32>
    %238 = arith.addf %236, %237 : vector<16x32xf32>
    %239 = arith.truncf %238 : vector<16x32xf32> to vector<16x32xbf16>
    %c1_83 = arith.constant 1 : index
    %c0_84 = arith.constant 0 : index
    %c0_85 = arith.constant 0 : index
    %240 = vector.load %arg8[%c1_83, %c0_84, %c0_85] : memref<2x32x64xbf16, #tpu.memory_space<vmem>>, vector<1x32x64xbf16>
    %241 = vector.shape_cast %240 : vector<1x32x64xbf16> to vector<32x64xbf16>
    %cst_86 = arith.constant dense<0.000000e+00> : vector<16x64xf32>
    %242 = tpu.matmul %239, %241, %cst_86 {dimension_numbers = #tpu.dot_dimension_numbers<[1], [0], [0], [1], [0, 0, 1, 1], [], []>} : vector<16x32xbf16>, vector<32x64xbf16>, vector<16x64xf32> -> vector<16x64xf32>
    %c1_87 = arith.constant 1 : index
    %c0_88 = arith.constant 0 : index
    %c0_89 = arith.constant 0 : index
    %243 = vector.load %arg9[%c1_87, %c0_88, %c0_89] : memref<2x1x64xf32, #tpu.memory_space<vmem>>, vector<1x1x64xf32>
    %244 = vector.shape_cast %243 : vector<1x1x64xf32> to vector<1x64xf32>
    %245 = vector.broadcast %244 : vector<1x64xf32> to vector<16x64xf32>
    %246 = arith.addf %242, %245 : vector<16x64xf32>
    %247 = arith.mulf %246, %246 : vector<16x64xf32>
    %248 = arith.mulf %246, %247 : vector<16x64xf32>
    %cst_90 = arith.constant 4.471500e-02 : f32
    %249 = vector.broadcast %cst_90 : f32 to vector<16x64xf32>
    %250 = arith.mulf %249, %248 : vector<16x64xf32>
    %251 = arith.addf %246, %250 : vector<16x64xf32>
    %cst_91 = arith.constant 0.797884583 : f32
    %252 = vector.broadcast %cst_91 : f32 to vector<16x64xf32>
    %253 = arith.mulf %252, %251 : vector<16x64xf32>
    %254 = math.tanh %253 : vector<16x64xf32>
    %cst_92 = arith.constant 1.000000e+00 : f32
    %255 = vector.broadcast %cst_92 : f32 to vector<16x64xf32>
    %256 = arith.addf %255, %254 : vector<16x64xf32>
    %cst_93 = arith.constant 5.000000e-01 : f32
    %257 = vector.broadcast %cst_93 : f32 to vector<16x64xf32>
    %258 = arith.mulf %257, %256 : vector<16x64xf32>
    %259 = arith.mulf %246, %258 : vector<16x64xf32>
    %260 = arith.truncf %259 : vector<16x64xf32> to vector<16x64xbf16>
    %c1_94 = arith.constant 1 : index
    %c0_95 = arith.constant 0 : index
    %c0_96 = arith.constant 0 : index
    %261 = vector.load %arg10[%c1_94, %c0_95, %c0_96] : memref<2x64x32xbf16, #tpu.memory_space<vmem>>, vector<1x64x32xbf16>
    %262 = vector.shape_cast %261 : vector<1x64x32xbf16> to vector<64x32xbf16>
    %cst_97 = arith.constant dense<0.000000e+00> : vector<16x32xf32>
    %263 = tpu.matmul %260, %262, %cst_97 {dimension_numbers = #tpu.dot_dimension_numbers<[1], [0], [0], [1], [0, 0, 1, 1], [], []>} : vector<16x64xbf16>, vector<64x32xbf16>, vector<16x32xf32> -> vector<16x32xf32>
    %264 = arith.addf %216, %263 : vector<16x32xf32>
    %265 = vector.extract_strided_slice %141 {offsets = [4, 0], sizes = [1, 32], strides = [1, 1]} : vector<5x32xf32> to vector<1x32xf32>
    %266 = vector.broadcast %265 : vector<1x32xf32> to vector<16x32xf32>
    %267 = arith.addf %264, %266 : vector<16x32xf32>
    %268 = vector.shape_cast %267 : vector<16x32xf32> to vector<2x8x32xf32>
    %269 = vector.extract_strided_slice %268 {offsets = [0, 0, 0], sizes = [2, 1, 32], strides = [1, 1, 1]} : vector<2x8x32xf32> to vector<2x1x32xf32>
    %270 = vector.shape_cast %269 : vector<2x1x32xf32> to vector<2x32xf32>
    %271 = arith.truncf %270 : vector<2x32xf32> to vector<2x32xbf16>
    %c0_98 = arith.constant 0 : index
    %c0_99 = arith.constant 0 : index
    %272 = vector.load %arg11[%c0_98, %c0_99] : memref<32x42xbf16, #tpu.memory_space<vmem>>, vector<32x42xbf16>
    %cst_100 = arith.constant dense<0.000000e+00> : vector<2x42xf32>
    %273 = tpu.matmul %271, %272, %cst_100 {dimension_numbers = #tpu.dot_dimension_numbers<[1], [0], [0], [1], [0, 0, 1, 1], [], []>} : vector<2x32xbf16>, vector<32x42xbf16>, vector<2x42xf32> -> vector<2x42xf32>
    %c0_101 = arith.constant 0 : index
    %c0_102 = arith.constant 0 : index
    %274 = vector.load %arg12[%c0_101, %c0_102] : memref<1x42xf32, #tpu.memory_space<vmem>>, vector<1x42xf32>
    %275 = vector.broadcast %274 : vector<1x42xf32> to vector<2x42xf32>
    %276 = arith.addf %273, %275 : vector<2x42xf32>
    %277 = vector.extract_strided_slice %276 {offsets = [0, 0], sizes = [2, 32], strides = [1, 1]} : vector<2x42xf32> to vector<2x32xf32>
    %278 = vector.extract_strided_slice %276 {offsets = [0, 32], sizes = [2, 10], strides = [1, 1]} : vector<2x42xf32> to vector<2x10xf32>
    %279 = arith.negf %278 : vector<2x10xf32>
    %280 = math.exp %279 : vector<2x10xf32>
    %cst_103 = arith.constant 1.000000e+00 : f32
    %281 = vector.broadcast %cst_103 : f32 to vector<2x10xf32>
    %282 = arith.addf %281, %280 : vector<2x10xf32>
    %283 = arith.divf %281, %282 : vector<2x10xf32>
    %284 = arith.mulf %277, %277 : vector<2x32xf32>
    %cst_104 = arith.constant dense<0.000000e+00> : vector<2xf32>
    %285 = vector.multi_reduction <add>, %284, %cst_104 [1] : vector<2x32xf32> to vector<2xf32>
    %286 = vector.shape_cast %285 : vector<2xf32> to vector<2x1xf32>
    %cst_105 = arith.constant 1.000000e-24 : f32
    %287 = vector.broadcast %cst_105 : f32 to vector<2x1xf32>
    %288 = arith.maximumf %286, %287 : vector<2x1xf32>
    %289 = math.rsqrt %288 : vector<2x1xf32>
    %290 = vector.broadcast %289 : vector<2x1xf32> to vector<2x32xf32>
    %291 = arith.mulf %277, %290 : vector<2x32xf32>
    %292 = arith.mulf %277, %277 : vector<2x32xf32>
    %293 = arith.mulf %277, %292 : vector<2x32xf32>
    %cst_106 = arith.constant 4.471500e-02 : f32
    %294 = vector.broadcast %cst_106 : f32 to vector<2x32xf32>
    %295 = arith.mulf %294, %293 : vector<2x32xf32>
    %296 = arith.addf %277, %295 : vector<2x32xf32>
    %cst_107 = arith.constant 0.797884583 : f32
    %297 = vector.broadcast %cst_107 : f32 to vector<2x32xf32>
    %298 = arith.mulf %297, %296 : vector<2x32xf32>
    %299 = math.tanh %298 : vector<2x32xf32>
    %cst_108 = arith.constant 1.000000e+00 : f32
    %300 = vector.broadcast %cst_108 : f32 to vector<2x32xf32>
    %301 = arith.addf %300, %299 : vector<2x32xf32>
    %cst_109 = arith.constant 5.000000e-01 : f32
    %302 = vector.broadcast %cst_109 : f32 to vector<2x32xf32>
    %303 = arith.mulf %302, %301 : vector<2x32xf32>
    %304 = arith.mulf %277, %303 : vector<2x32xf32>
    %305 = arith.truncf %304 : vector<2x32xf32> to vector<2x32xbf16>
    %c0_110 = arith.constant 0 : index
    %c0_111 = arith.constant 0 : index
    %306 = vector.load %arg13[%c0_110, %c0_111] : memref<32x16xbf16, #tpu.memory_space<vmem>>, vector<32x16xbf16>
    %cst_112 = arith.constant dense<0.000000e+00> : vector<2x16xf32>
    %307 = tpu.matmul %305, %306, %cst_112 {dimension_numbers = #tpu.dot_dimension_numbers<[1], [0], [0], [1], [0, 0, 1, 1], [], []>} : vector<2x32xbf16>, vector<32x16xbf16>, vector<2x16xf32> -> vector<2x16xf32>
    %c0_113 = arith.constant 0 : index
    %c0_114 = arith.constant 0 : index
    %308 = vector.load %arg14[%c0_113, %c0_114] : memref<1x16xf32, #tpu.memory_space<vmem>>, vector<1x16xf32>
    %309 = vector.broadcast %308 : vector<1x16xf32> to vector<2x16xf32>
    %310 = arith.addf %307, %309 : vector<2x16xf32>
    %311 = arith.mulf %310, %310 : vector<2x16xf32>
    %cst_115 = arith.constant dense<0.000000e+00> : vector<2xf32>
    %312 = vector.multi_reduction <add>, %311, %cst_115 [1] : vector<2x16xf32> to vector<2xf32>
    %313 = vector.shape_cast %312 : vector<2xf32> to vector<2x1xf32>
    %cst_116 = arith.constant 1.000000e-24 : f32
    %314 = vector.broadcast %cst_116 : f32 to vector<2x1xf32>
    %315 = arith.maximumf %313, %314 : vector<2x1xf32>
    %316 = math.rsqrt %315 : vector<2x1xf32>
    %317 = vector.broadcast %316 : vector<2x1xf32> to vector<2x16xf32>
    %318 = arith.mulf %310, %317 : vector<2x16xf32>
    %319 = tpu.concatenate %291, %283, %318 in 1 : vector<2x32xf32>, vector<2x10xf32>, vector<2x16xf32> -> vector<2x58xf32>
    %c0_117 = arith.constant 0 : index
    %c0_118 = arith.constant 0 : index
    %320 = vector.load %arg15[%c0_117, %c0_118] : memref<2x58xf32, #tpu.memory_space<vmem>>, vector<2x58xf32>
    tpu.vector_store %arg15[%c0_117, %c0_118], %319 {strides = array<i32>} : memref<2x58xf32, #tpu.memory_space<vmem>>, vector<2x58xf32>,
    return
  }
}

</mosaic_0001>

<bundles_post_ra>
// kernel: gaitformer_forward.1
= control target key start
LH: loop header
LB: loop body
LE: loop exit
PB: predicated region body
PF: predicated region fallthrough
CT: control target
= control target key end

     0   :  { %v2450_v0 = vmov 0.0   ;;  %vm2451_vm0 = vmmov 0   ;;  %vm104_vm1 = vcmask 1042432   ;;  %vm100_vm2 = vcmask 441344   ;;  %s2452_s19 = smov 42   ;;  %s3090_s4 = inlined_call_operand.vmem [shape: bf16[54,32], index: 4, kind: input, shape index: {}]   ;;  %s3091_s0 = inlined_call_operand.vmem [shape: f32[16,54], index: 0, kind: input, shape index: {}]   ;;  %s3092_s1 = inlined_call_operand.vmem [shape: f32[16,32], index: 1, kind: input, shape index: {}]   ;;  %s3093_s6 = inlined_call_operand.vmem [shape: bf16[2,4,32,32], index: 6, kind: input, shape index: {}]   ;;  %s3094_s5 = inlined_call_operand.vmem [shape: f32[2,4,32], index: 5, kind: input, shape index: {}]   ;;  %s3095_s7 = inlined_call_operand.vmem [shape: f32[2,5,32], index: 7, kind: input, shape index: {}]   ;;  %s3096_s3 = inlined_call_operand.vmem [shape: f32[64,32], index: 3, kind: input, shape index: {}]   ;;  %s3097_s2 = inlined_call_operand.vmem [shape: f32[64,16], index: 2, kind: input, shape index: {}]   ;;  %s3098_s8 = inlined_call_operand.vmem [shape: bf16[2,32,64], index: 8, kind: input, shape index: {}]   ;;  %s3099_s10 = inlined_call_operand.vmem [shape: bf16[2,64,32], index: 10, kind: input, shape index: {}]   ;;  %s3100_s9 = inlined_call_operand.vmem [shape: f32[2,1,64], index: 9, kind: input, shape index: {}]   ;;  %s3101_s11 = inlined_call_operand.vmem [shape: bf16[32,42], index: 11, kind: input, shape index: {}]   ;;  %s3102_s13 = inlined_call_operand.vmem [shape: bf16[32,16], index: 13, kind: input, shape index: {}]   ;;  %s3103_s12 = inlined_call_operand.vmem [shape: f32[1,42], index: 12, kind: input, shape index: {}]   ;;  %s3104_s14 = inlined_call_operand.vmem [shape: f32[1,16], index: 14, kind: input, shape index: {}]   ;;  %s3105_s15 = inlined_call_operand.vmem [shape: f32[2,58], index: 15, kind: output, shape index: {}]  }
   0x1   :  { %2131 = vmatprep.subr.bf16.mxu0 %v2450_v0  ;;  %v2308_v1 = vld [vmem:[%s3090_s4] sm:$0xff]   ;;  %2139 = vmatprep.mubr.msk.bf16.mxu0 %vm2451_vm0, %v2450_v0  ;;  %v2309_v2 = vld [vmem:[%s3090_s4 + $0x8] sm:$0xff]   ;;  %v2310_v3 = vld [vmem:[%s3090_s4 + $0x10] sm:$0xff]   ;;  %vm167_vm3 = vcmask 261120   ;;  %v195_v37 = vlaneseq  ;;  %vm491_vm4 = vcmask 130048   ;;  %vm906_vm5 = vcmask 523264  }
   0x2   :  { %2143 = vmatprep.subr.bf16.mxu1 %v2450_v0  ;;  %2147 = vmatprep.mubr.msk.bf16.mxu1 %vm2451_vm0, %v2450_v0  ;;  %v2311_v4 = vld [vmem:[%s3090_s4 + $0x18] ss:$0 sps:$4 sm:$0x77]   ;;  %v67_v5 = vld [vmem:[%s3091_s0] sm:$0xff]  ;;  %v68_v6 = vld [vmem:[%s3091_s0 + $0x8] sm:$0xff]  ;;  %vm1789_vm6 = vcmask 1041409  }
   0x3   :  { %2132 = vmatpush3.bf16.msra.mxu0 %v2308_v1  ;;  %v106_v7 = vsel %vm104_vm1, %v2311_v4, 0  ;;  %v69_v8 = vpack.c.bf16 %v68_v6, %v67_v5  ;;  %v77_v9 = vld [vmem:[%s3092_s1] sm:$0xff]  ;;  %v78_v11 = vld [vmem:[%s3092_s1 + $0x8] sm:$0xff]  ;;  %v2596_v40 = vshrl.u32 %v195_v37, 7  ;;  %v2316_v54 = vld [vmem:[%s3093_s6 + $0x10] sm:$0xff]   ;;  %vm1854_vm7 = vcmask 254976  }
   0x4   :  { %2133 = vmatprep.subr.bf16.mxu0 %v2450_v0  ;;  %v2312_v29 = vld [vmem:[%s3093_s6] sm:$0xff]   ;;  %v2314_v31 = vld [vmem:[%s3093_s6 + $0x8] sm:$0xff]   ;;  %v2317_v56 = vld [vmem:[%s3093_s6 + $0x18] sm:$0xff]   ;;  %vm1937_vm8 = vcmask 123904   ;;  %vm1949_vm9 = vcmask 343040   ;;  %vm1951_vm10 = vcmask 467968  }
   0x5   :  { %v2313_v30 = vld [vmem:[%s3093_s6 + $0x20] sm:$0xff]   ;;  %2144 = vmatpush3.bf16.msra.mxu1 %v2312_v29  ;;  %v2315_v32 = vld [vmem:[%s3093_s6 + $0x28] sm:$0xff]   ;;  %v2599_v41 = vsub.s32 0, %v2596_v40  ;;  %v2609_v46 = vsub.s32 1, %v2596_v40  ;;  %v2631_v58 = vsub.s32 2, %v2596_v40  ;;  %v2645_v1 = vld [vmem:[%s3096_s3 + $0x10] sm:$0xff] }
   0x6   :  { %2145 = vmatprep.subr.bf16.mxu1 %v2450_v0  ;;  %v2604_v42 = vld [vmem:[%s3094_s5] sm:$0xf]  ;;  %v2655_v6 = vld [vmem:[%s3096_s3 + $0x30] sm:$0xff] }
   0x7   :  { %2134 = vmatpush3.bf16.msra.mxu0 %v2309_v2  ;;  %v198_v45 = vrot.slane %v2604_v42, %v2599_v41  ;;  %v204_v50 = vrot.slane %v2604_v42, %v2609_v46  ;;  %v2628_v57 = vld [vmem:[%s3095_s7] sm:$0x1f] }
   0x8   :  { %2135 = vmatprep.subr.bf16.mxu0 %v2450_v0  ;;  %v211_v59 = vrot.slane %v2628_v57, %v2599_v41  ;;  %v328_v61 = vrot.slane %v2628_v57, %v2631_v58  ;;  %v2640_v63 = vld [vmem:[%s3096_s3] sm:$0xff]  ;;  %v271_v29 = vrot.slane %v2628_v57, %v2609_v46 }
   0x9   :  { %2146 = vmatpush3.bf16.msra.mxu1 %v2314_v31  ;;  %v2650_v5 = vld [vmem:[%s3096_s3 + $0x20] sm:$0xff] }
   0xa   :  { %2151 = vmatprep.subr.bf16.mxu1 %v2450_v0 }
   0xb   :  { %2136 = vmatpush3.bf16.msra.mxu0 %v2310_v3 }
   0xc   :  { %2137 = vmatprep.subr.bf16.mxu0 %v2450_v0 }
   0xf   :  { %2138 = vmatpush3.bf16.msra.mxu0 %v106_v7  ;;  %v2660_v7 = vld [vmem:[%s3096_s3 + $0x8] sm:$0xff] }
  0x10   :  { %2159 = vmatprep.subr.bf16.mxu0 %v2450_v0 }
  0x12   :  { %2140 = vmatmul.mubr.msk.bf16.vlgmr.msra.gmra.mrb[0].mxu0 %vm100_vm2, %v69_v8 }
  0x13   :  { %2163 = vmatprep.mubr.msk.bf16.mxu0 %vm2451_vm0, %v2450_v0  ;;  %2160 = vmatpush3.bf16.msra.mxu0 %v2313_v30 }
  0x14   :  { %2161 = vmatprep.subr.bf16.mxu0 %v2450_v0 }
  0x17   :  { %2162 = vmatpush3.bf16.msra.mxu0 %v2315_v32 }
  0xe5   :  { %v142_v10 = vpop.f32.mrb[0].mxu0 }
  0xe6   :  { %v2569_v12 = vadd.f32 %v142_v10, %v77_v9  ;;  %v2141_v13 = vpop.f32.mrb[1].mxu0  ;;  %v2665_v10 = vld [vmem:[%s3096_s3 + $0x18] sm:$0xff] }
  0xe7   :  { %v145_v14 = vpop.f32.mrb[2].mxu0  ;;  %v2675_v13 = vld [vmem:[%s3096_s3 + $0x38] sm:$0xff] }
  0xe8   :  { %v2571_v15 = vadd.f32 %v145_v14, %v78_v11  ;;  %v2142_v16 = vpop.f32.mrb[3].mxu0  ;;  %v168_v17 = vsel %vm167_vm3, %v2569_v12, 0.0  ;;  %v2670_v11 = vld [vmem:[%s3096_s3 + $0x28] sm:$0xff] }
  0xe9   :  { %169 = vadd.xlane.f32.xlu0 %v168_v17 }
  0xea   :  { %v171_v18 = vsel %vm167_vm3, %v2571_v15, 0.0 }
  0xed   :  { %172 = vadd.xlane.f32.xlu0 %v171_v18 }
 0x176   :  { %v170_v19 = vpop.xlane.xlu0 %169 }
 0x177   :  { %v175_v20 = vmul.f32 0.03125, %v170_v19 }
 0x179   :  { %v177_v21 = vsub.f32 %v2569_v12, %v175_v20 }
 0x17a   :  { %v173_v22 = vpop.xlane.xlu0 %172 }
 0x17b   :  { %v176_v23 = vmul.f32 0.03125, %v173_v22  ;;  %v179_v24 = vmul.f32 %v177_v21, %v177_v21 }
 0x17d   :  { %v178_v25 = vsub.f32 %v2571_v15, %v176_v23  ;;  %v181_v26 = vsel %vm167_vm3, %v179_v24, 0.0 }
 0x17e   :  { %182 = vadd.xlane.f32.xlu1 %v181_v26 }
 0x17f   :  { %v180_v27 = vmul.f32 %v178_v25, %v178_v25 }
 0x181   :  { %v184_v28 = vsel %vm167_vm3, %v180_v27, 0.0 }
 0x182   :  { %185 = vadd.xlane.f32.xlu1 %v184_v28 }
 0x20b   :  { %v183_v33 = vpop.xlane.xlu1 %182 }
 0x20c   :  { %v187_v34 = vmul.f32 0.03125, %v183_v33 }
 0x20e   :  { %v189_v35 = vadd.f32 1e-05, %v187_v34 }
 0x20f   :  { %v186_v36 = vpop.xlane.xlu1 %185 }
 0x210   :  { %2344 = vrsqrt.f32 %v189_v35  ;;  %v188_v38 = vmul.f32 0.03125, %v186_v36 }
 0x212   :  { %v190_v39 = vadd.f32 1e-05, %v188_v38 }
 0x214   :  { %2346 = vrsqrt.f32 %v190_v39 }
 0x21a   :  { %v2345_v43 = vpop.eup %2344 }
 0x21b   :  { %v193_v44 = vmul.f32 %v2345_v43, %v177_v21 }
 0x21d   :  { %v199_v49 = vmul.f32 %v198_v45, %v193_v44 }
 0x21e   :  { %v2347_v47 = vpop.eup %2346 }
 0x21f   :  { %v194_v48 = vmul.f32 %v2347_v47, %v178_v25  ;;  %v205_v52 = vadd.f32 %v204_v50, %v199_v49 }
 0x221   :  { %v200_v51 = vmul.f32 %v198_v45, %v194_v48  ;;  %v2700_v48 = vld [vmem:[%s3097_s2] sm:$0xff] }
 0x223   :  { %v206_v53 = vadd.f32 %v204_v50, %v200_v51 }
 0x225   :  { %v207_v55 = vpack.c.bf16 %v206_v53, %v205_v52  ;;  %v2705_v53 = vld [vmem:[%s3097_s2 + $0x8] sm:$0xff] }
 0x227   :  { %2148 = vmatmul.mubr.msk.bf16.vlgmr.msra.gmra.mrb[0].mxu1 %vm167_vm3, %v207_v55  ;;  %2164 = vmatmul.mubr.msk.bf16.vlgmr.msra.gmra.mrb[4].mxu0 %vm167_vm3, %v207_v55 }
 0x228   :  { %2152 = vmatpush3.bf16.msra.mxu1 %v2316_v54  ;;  %2155 = vmatprep.mubr.msk.bf16.mxu1 %vm2451_vm0, %v2450_v0  ;;  %v2710_v54 = vld [vmem:[%s3097_s2 + $0x10] sm:$0xff] }
 0x229   :  { %2153 = vmatprep.subr.bf16.mxu1 %v2450_v0 }
 0x22c   :  { %2154 = vmatpush3.bf16.msra.mxu1 %v2317_v56 }
 0x22f   :  { %2156 = vmatmul.mubr.msk.bf16.vlgmr.msra.gmra.mrb[4].mxu1 %vm167_vm3, %v207_v55 }
 0x2fa   :  { %v261_v60 = vpop.f32.mrb[0].mxu1  ;;  %v375_v62 = vpop.f32.mrb[4].mxu0 }
 0x2fb   :  { %v262_v2 = vadd.f32 %v261_v60, %v211_v59  ;;  %v2149_v3 = vpop.f32.mrb[1].mxu1  ;;  %v2165_v4 = vpop.f32.mrb[5].mxu0  ;;  %v376_v17 = vadd.f32 %v375_v62, %v328_v61  ;;  %v2716_v60 = vld [vmem:[%s3097_s2 + $0x18] sm:$0xff] }
 0x2fc   :  { %v264_v8 = vpop.f32.mrb[2].mxu1  ;;  %v378_v9 = vpop.f32.mrb[6].mxu0 }
 0x2fd   :  { %v2150_v14 = vpop.f32.mrb[3].mxu1  ;;  %v2166_v16 = vpop.f32.mrb[7].mxu0  ;;  %v265_v18 = vadd.f32 %v264_v8, %v211_v59  ;;  %v379_v19 = vadd.f32 %v378_v9, %v328_v61  ;;  %v382_v20 = vmul.f32 %v262_v2, %v2640_v63  ;;  %v384_v21 = vmul.f32 %v262_v2, %v2645_v1 }
 0x2fe   :  { %v386_v22 = vmul.f32 %v262_v2, %v2650_v5  ;;  %v388_v23 = vmul.f32 %v262_v2, %v2655_v6  ;;  %v2726_v14 = vld [vmem:[%s3097_s2 + $0x20] sm:$0xff] }
 0x2ff   :  { %v383_v24 = vmul.f32 %v265_v18, %v2660_v7  ;;  %v385_v25 = vmul.f32 %v265_v18, %v2665_v10  ;;  %v387_v26 = vmul.f32 %v265_v18, %v2670_v11  ;;  %v389_v27 = vmul.f32 %v265_v18, %v2675_v13 }
 0x300   :  { %v584_v28 = vpack.c.bf16 %v379_v19, %v376_v17 }
 0x301   :  { %v391_v30 = vpack.c.bf16 %v385_v25, %v384_v21  ;;  %v390_v32 = vpack.c.bf16 %v383_v24, %v382_v20  ;;  %v392_v33 = vpack.c.bf16 %v387_v26, %v386_v22  ;;  %v393_v34 = vpack.c.bf16 %v389_v27, %v388_v23  ;;  %v2732_v21 = vld [vmem:[%s3097_s2 + $0x28] sm:$0xff]  ;;  %v2737_v22 = vld [vmem:[%s3097_s2 + $0x30] sm:$0xff]  ;;  %v2744_v27 = vld [vmem:[%s3097_s2 + $0x38] sm:$0xff] }
 0x302   :  { %v318_v31 = vpop.f32.mrb[4].mxu1  ;;  %2177 = vmatprep.subr.bf16.mxu0 %v584_v28 }
 0x303   :  { %v2157_v35 = vpop.f32.mrb[5].mxu1  ;;  %2178 = vmatpush3.bf16.msra.mxu0 %v584_v28  ;;  %2169 = vmatprep.mubr.msk.bf16.mxu1 %vm167_vm3, %v390_v32  ;;  %v319_v37 = vadd.f32 %v318_v31, %v271_v29 }
 0x304   :  { %v321_v36 = vpop.f32.mrb[6].mxu1  ;;  %2195 = vmatprep.subr.bf16.mxu0 %v2450_v0 }
 0x305   :  { %v322_v38 = vadd.f32 %v321_v36, %v271_v29  ;;  %v2158_v39 = vpop.f32.mrb[7].mxu1 }
 0x307   :  { %v394_v43 = vpack.c.bf16 %v322_v38, %v319_v37 }
 0x309   :  { %2303 = vmatprep.subr.msk.bf16.mxu1 %vm167_vm3, %v394_v43  ;;  %v408_v44 = vsel %vm167_vm3, %v394_v43, 0 }
 0x30a   :  { %2168 = vmatpush3.bf16.xpose.msra.mxu1 %v408_v44 }
 0x30b   :  { %2187 = vmatprep.subr.bf16.mxu1 %v2450_v0 }
 0x311   :  { %2170 = vmatmul.mubr.msk.bf16.vlgmr.msra.gmra.mrb[8].mxu1 %vm167_vm3, %v391_v30 }
 0x312   :  { %2173 = vmatprep.mubr.msk.bf16.mxu1 %vm167_vm3, %v392_v33 }
 0x319   :  { %2174 = vmatmul.mubr.msk.bf16.gmra.mrb[12].mxu1 %vm167_vm3, %v393_v34 }
 0x31a   :  { %2191 = vmatprep.mubr.msk.bf16.mxu1 %vm2451_vm0, %v2450_v0 }
 0x3e4   :  { %v2171_v45 = vpop.f32.mrb[8].mxu1 }
 0x3e5   :  { %v444_v47 = vpop.f32.mrb[9].mxu1  ;;  %v477_v49 = vmul.f32 0.35355338, %v2171_v45 }
 0x3e6   :  { %v475_v50 = vmul.f32 0.35355338, %v444_v47  ;;  %v2172_v51 = vpop.f32.mrb[10].mxu1 }
 0x3e7   :  { %v447_v52 = vpop.f32.mrb[11].mxu1  ;;  %v478_v55 = vmul.f32 0.35355338, %v2172_v51  ;;  %v485_v2 = vadd.f32 %v477_v49, %v2710_v54 }
 0x3e8   :  { %v476_v56 = vmul.f32 0.35355338, %v447_v52  ;;  %v483_v59 = vadd.f32 %v475_v50, %v2700_v48 }
 0x3e9   :  { %v486_v8 = vadd.f32 %v478_v55, %v2716_v60  ;;  %v498_v19 = vsel %vm491_vm4, %v485_v2, -inf }
 0x3ea   :  { %v492_v61 = vsel %vm491_vm4, %v483_v59, -inf  ;;  %v484_v62 = vadd.f32 %v476_v56, %v2705_v53 }
 0x3eb   :  { %493 = vmax.xlane.f32.xlu0 %v492_v61  ;;  %v501_v25 = vsel %vm491_vm4, %v486_v8, -inf }
 0x3ec   :  { %v2175_v3 = vpop.f32.mrb[12].mxu1  ;;  %v495_v4 = vsel %vm491_vm4, %v484_v62, -inf }
 0x3ed   :  { %496 = vmax.xlane.f32.xlu1 %v495_v4  ;;  %v460_v9 = vpop.f32.mrb[13].mxu1  ;;  %v481_v16 = vmul.f32 0.35355338, %v2175_v3 }
 0x3ee   :  { %v479_v17 = vmul.f32 0.35355338, %v460_v9  ;;  %v2176_v18 = vpop.f32.mrb[14].mxu1 }
 0x3ef   :  { %499 = vmax.xlane.f32.xlu0 %v498_v19  ;;  %v463_v20 = vpop.f32.mrb[15].mxu1  ;;  %v482_v23 = vmul.f32 0.35355338, %v2176_v18  ;;  %v489_v30 = vadd.f32 %v481_v16, %v2737_v22 }
 0x3f0   :  { %v480_v24 = vmul.f32 0.35355338, %v463_v20  ;;  %v487_v26 = vadd.f32 %v479_v17, %v2726_v14 }
 0x3f1   :  { %502 = vmax.xlane.f32.xlu1 %v501_v25  ;;  %v490_v32 = vadd.f32 %v482_v23, %v2744_v27  ;;  %v510_v33 = vsel %vm491_vm4, %v489_v30, -inf }
 0x3f2   :  { %v504_v28 = vsel %vm491_vm4, %v487_v26, -inf  ;;  %v488_v29 = vadd.f32 %v480_v24, %v2732_v21 }
 0x3f3   :  { %505 = vmax.xlane.f32.xlu0 %v504_v28  ;;  %v513_v34 = vsel %vm491_vm4, %v490_v32, -inf }
 0x3f4   :  { %v507_v31 = vsel %vm491_vm4, %v488_v29, -inf }
 0x3f5   :  { %508 = vmax.xlane.f32.xlu1 %v507_v31 }
 0x3f7   :  { %511 = vmax.xlane.f32.xlu0 %v510_v33 }
 0x3f9   :  { %514 = vmax.xlane.f32.xlu1 %v513_v34 }
 0x478   :  { %v494_v35 = vpop.xlane.xlu0 %493 }
 0x479   :  { %v516_v36 = vsub.f32 %v483_v59, %v494_v35 }
 0x47a   :  { %v497_v37 = vpop.xlane.xlu1 %496 }
 0x47b   :  { %v524_v38 = vmul.f32 1.442695, %v516_v36  ;;  %v517_v39 = vsub.f32 %v484_v62, %v497_v37 }
 0x47c   :  { %v500_v43 = vpop.xlane.xlu0 %499 }
 0x47d   :  { %2348 = vpow2.f32 %v524_v38  ;;  %v526_v44 = vmul.f32 1.442695, %v517_v39  ;;  %v518_v45 = vsub.f32 %v485_v2, %v500_v43 }
 0x47e   :  { %v503_v47 = vpop.xlane.xlu1 %502 }
 0x47f   :  { %2350 = vpow2.f32 %v526_v44  ;;  %v528_v49 = vmul.f32 1.442695, %v518_v45  ;;  %v519_v50 = vsub.f32 %v486_v8, %v503_v47 }
 0x480   :  { %v506_v51 = vpop.xlane.xlu0 %505 }
 0x481   :  { %2352 = vpow2.f32 %v528_v49  ;;  %v530_v52 = vmul.f32 1.442695, %v519_v50  ;;  %v520_v55 = vsub.f32 %v487_v26, %v506_v51 }
 0x482   :  { %v509_v56 = vpop.xlane.xlu1 %508 }
 0x483   :  { %2354 = vpow2.f32 %v530_v52  ;;  %v532_v61 = vmul.f32 1.442695, %v520_v55  ;;  %v521_v3 = vsub.f32 %v488_v29, %v509_v56 }
 0x484   :  { %v512_v59 = vpop.xlane.xlu0 %511 }
 0x485   :  { %2356 = vpow2.f32 %v532_v61  ;;  %v534_v4 = vmul.f32 1.442695, %v521_v3  ;;  %v522_v62 = vsub.f32 %v489_v30, %v512_v59 }
 0x486   :  { %v515_v9 = vpop.xlane.xlu1 %514 }
 0x487   :  { %v2349_v16 = vpop.eup %2348  ;;  %2358 = vpow2.f32 %v534_v4  ;;  %v536_v2 = vmul.f32 1.442695, %v522_v62  ;;  %v523_v17 = vsub.f32 %v490_v32, %v515_v9 }
 0x488   :  { %v540_v18 = vsel %vm491_vm4, %v2349_v16, 0.0 }
 0x489   :  { %v2351_v8 = vpop.eup %2350  ;;  %2360 = vpow2.f32 %v536_v2  ;;  %v538_v19 = vmul.f32 1.442695, %v523_v17  ;;  %541 = vadd.xlane.f32.xlu0 %v540_v18 }
 0x48a   :  { %v543_v20 = vsel %vm491_vm4, %v2351_v8, 0.0 }
 0x48b   :  { %v2353_v23 = vpop.eup %2352  ;;  %2362 = vpow2.f32 %v538_v19  ;;  %544 = vadd.xlane.f32.xlu1 %v543_v20 }
 0x48c   :  { %v546_v24 = vsel %vm491_vm4, %v2353_v23, 0.0 }
 0x48d   :  { %v2355_v25 = vpop.eup %2354  ;;  %547 = vadd.xlane.f32.xlu0 %v546_v24 }
 0x48e   :  { %v549_v26 = vsel %vm491_vm4, %v2355_v25, 0.0 }
 0x48f   :  { %v2357_v28 = vpop.eup %2356  ;;  %550 = vadd.xlane.f32.xlu1 %v549_v26 }
 0x490   :  { %v552_v29 = vsel %vm491_vm4, %v2357_v28, 0.0 }
 0x491   :  { %v2359_v30 = vpop.eup %2358  ;;  %553 = vadd.xlane.f32.xlu0 %v552_v29 }
 0x492   :  { %v555_v31 = vsel %vm491_vm4, %v2359_v30, 0.0 }
 0x493   :  { %v2361_v32 = vpop.eup %2360  ;;  %556 = vadd.xlane.f32.xlu1 %v555_v31 }
 0x494   :  { %v558_v33 = vsel %vm491_vm4, %v2361_v32, 0.0 }
 0x495   :  { %v2363_v34 = vpop.eup %2362  ;;  %559 = vadd.xlane.f32.xlu0 %v558_v33 }
 0x496   :  { %v561_v35 = vsel %vm491_vm4, %v2363_v34, 0.0 }
 0x497   :  { %562 = vadd.xlane.f32.xlu1 %v561_v35 }
 0x516   :  { %v542_v36 = vpop.xlane.xlu0 %541 }
 0x517   :  { %2364 = vrcp.f32 %v542_v36 }
 0x518   :  { %v545_v37 = vpop.xlane.xlu1 %544 }
 0x519   :  { %2366 = vrcp.f32 %v545_v37 }
 0x51a   :  { %v548_v38 = vpop.xlane.xlu0 %547 }
 0x51b   :  { %2368 = vrcp.f32 %v548_v38 }
 0x51c   :  { %v551_v39 = vpop.xlane.xlu1 %550 }
 0x51d   :  { %2370 = vrcp.f32 %v551_v39 }
 0x51e   :  { %v554_v43 = vpop.xlane.xlu0 %553 }
 0x51f   :  { %2372 = vrcp.f32 %v554_v43 }
 0x520   :  { %v557_v44 = vpop.xlane.xlu1 %556 }
 0x521   :  { %v2365_v45 = vpop.eup %2364  ;;  %2374 = vrcp.f32 %v557_v44 }
 0x522   :  { %v560_v47 = vpop.xlane.xlu0 %559  ;;  %v572_v51 = vmul.f32 %v2365_v45, %v2349_v16 }
 0x523   :  { %v2367_v49 = vpop.eup %2366  ;;  %2376 = vrcp.f32 %v560_v47 }
 0x524   :  { %v563_v50 = vpop.xlane.xlu1 %562  ;;  %v573_v52 = vmul.f32 %v2367_v49, %v2351_v8 }
 0x525   :  { %v2369_v55 = vpop.eup %2368  ;;  %2378 = vrcp.f32 %v563_v50 }
 0x526   :  { %v580_v56 = vpack.c.bf16 %v573_v52, %v572_v51  ;;  %v574_v3 = vmul.f32 %v2369_v55, %v2353_v23  ;;  %v2318_v23 = vld [vmem:[%s3093_s6 + $0x30] sm:$0xff]  }
 0x527   :  { %v2371_v61 = vpop.eup %2370  ;;  %2188 = vmatpush3.bf16.msra.mxu1 %v2318_v23 }
 0x528   :  { %v575_v59 = vmul.f32 %v2371_v61, %v2355_v25  ;;  %2179 = vmatprep.mubr.msk.bf16.mxu0 %vm491_vm4, %v580_v56  ;;  %2189 = vmatprep.subr.bf16.mxu1 %v2450_v0  ;;  %v2319_v25 = vld [vmem:[%s3093_s6 + $0x38] sm:$0xff]  }
 0x529   :  { %v2373_v4 = vpop.eup %2372 }
 0x52a   :  { %v581_v62 = vpack.c.bf16 %v575_v59, %v574_v3  ;;  %v576_v2 = vmul.f32 %v2373_v4, %v2357_v28 }
 0x52b   :  { %v2375_v9 = vpop.eup %2374  ;;  %2190 = vmatpush3.bf16.msra.mxu1 %v2319_v25 }
 0x52c   :  { %2180 = vmatmul.mubr.msk.bf16.vlgmr.msra.gmra.mrb[8].mxu0 %vm491_vm4, %v581_v62  ;;  %v577_v17 = vmul.f32 %v2375_v9, %v2359_v30  ;;  %2203 = vmatprep.subr.bf16.mxu1 %v2450_v0 }
 0x52d   :  { %v2377_v18 = vpop.eup %2376 }
 0x52e   :  { %v582_v19 = vpack.c.bf16 %v577_v17, %v576_v2  ;;  %v578_v16 = vmul.f32 %v2377_v18, %v2361_v32  ;;  %v2795_v18 = vsub.s32 3, %v2596_v40 }
 0x52f   :  { %v2379_v20 = vpop.eup %2378 }
 0x530   :  { %2183 = vmatprep.mubr.msk.bf16.mxu0 %vm491_vm4, %v582_v19  ;;  %v579_v8 = vmul.f32 %v2379_v20, %v2363_v34  ;;  %v746_v19 = vrot.slane %v2628_v57, %v2795_v18 }
 0x532   :  { %v583_v24 = vpack.c.bf16 %v579_v8, %v578_v16 }
 0x534   :  { %2184 = vmatmul.mubr.msk.bf16.gmra.mrb[12].mxu0 %vm491_vm4, %v583_v24 }
 0x535   :  { %2199 = vmatprep.mubr.msk.bf16.mxu0 %vm2451_vm0, %v2450_v0 }
 0x5ff   :  { %v2181_v26 = vpop.f32.mrb[8].mxu0 }
 0x600   :  { %v664_v28 = vmul.f32 %v2181_v26, %v2645_v1  ;;  %v631_v29 = vpop.f32.mrb[9].mxu0 }
 0x601   :  { %v662_v30 = vmul.f32 %v631_v29, %v2640_v63  ;;  %v2182_v31 = vpop.f32.mrb[10].mxu0 }
 0x602   :  { %v671_v32 = vsel %vm167_vm3, %v664_v28, 0.0  ;;  %v665_v33 = vmul.f32 %v2182_v31, %v2665_v10  ;;  %v634_v34 = vpop.f32.mrb[11].mxu0 }
 0x603   :  { %v670_v35 = vsel %vm167_vm3, %v662_v30, 0.0  ;;  %v663_v36 = vmul.f32 %v634_v34, %v2660_v7 }
 0x604   :  { %v672_v37 = vadd.f32 %v671_v32, %v670_v35  ;;  %v678_v38 = vsel %vm167_vm3, %v665_v33, 0.0 }
 0x605   :  { %v677_v39 = vsel %vm167_vm3, %v663_v36, 0.0 }
 0x606   :  { %v679_v43 = vadd.f32 %v678_v38, %v677_v39  ;;  %v2320_v39 = vld [vmem:[%s3098_s8] sm:$0xff]  }
 0x607   :  { %v2185_v44 = vpop.f32.mrb[12].mxu0  ;;  %2196 = vmatpush3.bf16.msra.mxu0 %v2320_v39 }
 0x608   :  { %v647_v45 = vpop.f32.mrb[13].mxu0  ;;  %v668_v47 = vmul.f32 %v2185_v44, %v2655_v6  ;;  %2197 = vmatprep.subr.bf16.mxu0 %v2450_v0 }
 0x609   :  { %v666_v49 = vmul.f32 %v647_v45, %v2650_v5  ;;  %v2186_v50 = vpop.f32.mrb[14].mxu0 }
 0x60a   :  { %v650_v51 = vpop.f32.mrb[15].mxu0  ;;  %v669_v55 = vmul.f32 %v2186_v50, %v2675_v13  ;;  %v675_v3 = vsel %vm167_vm3, %v668_v47, 0.0 }
 0x60b   :  { %v673_v52 = vsel %vm167_vm3, %v666_v49, 0.0  ;;  %v667_v56 = vmul.f32 %v650_v51, %v2670_v11 }
 0x60c   :  { %v674_v61 = vadd.f32 %v673_v52, %v672_v37  ;;  %v682_v9 = vsel %vm167_vm3, %v669_v55, 0.0  ;;  %v778_v52 = vrot.slane %v2604_v42, %v2631_v58 }
 0x60d   :  { %v680_v59 = vsel %vm167_vm3, %v667_v56, 0.0 }
 0x60e   :  { %v676_v4 = vadd.f32 %v675_v3, %v674_v61  ;;  %v681_v62 = vadd.f32 %v680_v59, %v679_v43  ;;  %v2321_v43 = vld [vmem:[%s3098_s8 + $0x8] sm:$0xff]   ;;  %v784_v3 = vrot.slane %v2604_v42, %v2795_v18 }
 0x60f   :  { %2198 = vmatpush3.bf16.msra.mxu0 %v2321_v43  ;;  %v2323_v42 = vld [vmem:[%s3099_s10 + $0x8] sm:$0xff]  }
 0x610   :  { %v683_v2 = vadd.f32 %v682_v9, %v681_v62  ;;  %2215 = vmatprep.subr.bf16.mxu0 %v2450_v0 }
 0x612   :  { %v684_v17 = vpack.c.bf16 %v683_v2, %v676_v4 }
 0x614   :  { %2192 = vmatmul.mubr.msk.bf16.vlgmr.msra.gmra.mrb[16].mxu1 %vm167_vm3, %v684_v17 }
 0x615   :  { %2211 = vmatprep.mubr.msk.bf16.mxu1 %vm2451_vm0, %v2450_v0 }
 0x6e7   :  { %v734_v20 = vpop.f32.mrb[16].mxu1 }
 0x6e8   :  { %v741_v16 = vadd.f32 %v734_v20, %v2569_v12  ;;  %v2193_v8 = vpop.f32.mrb[17].mxu1  ;;  %v2324_v20 = vld [vmem:[%s3099_s10 + $0x10] sm:$0xff]  }
 0x6e9   :  { %v737_v24 = vpop.f32.mrb[18].mxu1  ;;  %v1982_v8 = vld [vmem:[%s3100_s9] ss:$0 sm:$0xff] }
 0x6ea   :  { %v2800_v23 = vadd.f32 %v746_v19, %v741_v16  ;;  %v742_v25 = vadd.f32 %v737_v24, %v2571_v15  ;;  %v2194_v26 = vpop.f32.mrb[19].mxu1  ;;  %v2325_v16 = vld [vmem:[%s3099_s10 + $0x18] sm:$0xff]  }
 0x6ec   :  { %v2803_v28 = vadd.f32 %v746_v19, %v742_v25  ;;  %v749_v29 = vsel %vm167_vm3, %v2800_v23, 0.0  ;;  %v2322_v19 = vld [vmem:[%s3099_s10] sm:$0xff]  }
 0x6ed   :  { %750 = vadd.xlane.f32.xlu0 %v749_v29  ;;  %2204 = vmatpush3.bf16.msra.mxu1 %v2322_v19 }
 0x6ee   :  { %v752_v30 = vsel %vm167_vm3, %v2803_v28, 0.0  ;;  %2205 = vmatprep.subr.bf16.mxu1 %v2450_v0 }
 0x6ef   :  { %753 = vadd.xlane.f32.xlu1 %v752_v30 }
 0x6f1   :  { %2206 = vmatpush3.bf16.msra.mxu1 %v2323_v42 }
 0x6f2   :  { %2207 = vmatprep.subr.bf16.mxu1 %v2450_v0 }
 0x6f5   :  { %2208 = vmatpush3.bf16.msra.mxu1 %v2324_v20 }
 0x6f6   :  { %2209 = vmatprep.subr.bf16.mxu1 %v2450_v0 }
 0x6f9   :  { %2210 = vmatpush3.bf16.msra.mxu1 %v2325_v16 }
 0x6fa   :  { %2231 = vmatprep.subr.bf16.mxu1 %v2450_v0 }
 0x77a   :  { %v751_v31 = vpop.xlane.xlu0 %750 }
 0x77b   :  { %v755_v32 = vmul.f32 0.03125, %v751_v31 }
 0x77c   :  { %v754_v12 = vpop.xlane.xlu1 %753 }
 0x77d   :  { %v757_v33 = vsub.f32 %v2800_v23, %v755_v32  ;;  %v756_v34 = vmul.f32 0.03125, %v754_v12 }
 0x77f   :  { %v758_v35 = vsub.f32 %v2803_v28, %v756_v34  ;;  %v759_v15 = vmul.f32 %v757_v33, %v757_v33 }
 0x781   :  { %v761_v36 = vsel %vm167_vm3, %v759_v15, 0.0  ;;  %v760_v37 = vmul.f32 %v758_v35, %v758_v35 }
 0x782   :  { %762 = vadd.xlane.f32.xlu0 %v761_v36 }
 0x783   :  { %v764_v38 = vsel %vm167_vm3, %v760_v37, 0.0 }
 0x784   :  { %765 = vadd.xlane.f32.xlu1 %v764_v38 }
 0x80f   :  { %v763_v44 = vpop.xlane.xlu0 %762 }
 0x810   :  { %v767_v45 = vmul.f32 0.03125, %v763_v44 }
 0x811   :  { %v766_v47 = vpop.xlane.xlu1 %765 }
 0x812   :  { %v769_v49 = vadd.f32 1e-05, %v767_v45  ;;  %v768_v50 = vmul.f32 0.03125, %v766_v47 }
 0x814   :  { %2380 = vrsqrt.f32 %v769_v49  ;;  %v770_v51 = vadd.f32 1e-05, %v768_v50 }
 0x816   :  { %2382 = vrsqrt.f32 %v770_v51 }
 0x81e   :  { %v2381_v55 = vpop.eup %2380 }
 0x81f   :  { %v773_v56 = vmul.f32 %v2381_v55, %v757_v33 }
 0x820   :  { %v2383_v61 = vpop.eup %2382 }
 0x821   :  { %v779_v59 = vmul.f32 %v778_v52, %v773_v56  ;;  %v774_v4 = vmul.f32 %v2383_v61, %v758_v35  ;;  %v955_v56 = vsub.s32 4, %v2596_v40 }
 0x823   :  { %v780_v62 = vmul.f32 %v778_v52, %v774_v4  ;;  %v785_v9 = vadd.f32 %v784_v3, %v779_v59  ;;  %v956_v61 = vrot.slane %v2628_v57, %v955_v56 }
 0x825   :  { %v786_v2 = vadd.f32 %v784_v3, %v780_v62 }
 0x827   :  { %v787_v17 = vpack.c.bf16 %v786_v2, %v785_v9 }
 0x829   :  { %2200 = vmatmul.mubr.msk.bf16.vlgmr.msra.gmra.mrb[16].mxu0 %vm167_vm3, %v787_v17 }
 0x82a   :  { %2219 = vmatprep.mubr.msk.bf16.mxu0 %vm2451_vm0, %v2450_v0 }
 0x8fc   :  { %v848_v24 = vpop.f32.mrb[16].mxu0 }
 0x8fd   :  { %v849_v25 = vadd.f32 %v1982_v8, %v848_v24  ;;  %v2201_v26 = vpop.f32.mrb[17].mxu0 }
 0x8fe   :  { %v851_v29 = vpop.f32.mrb[18].mxu0 }
 0x8ff   :  { %v855_v30 = vmul.f32 %v849_v25, %v849_v25  ;;  %v852_v31 = vadd.f32 %v1982_v8, %v851_v29  ;;  %v2202_v32 = vpop.f32.mrb[19].mxu0 }
 0x900   :  { %v2327_v32 = vld [vmem:[%s3093_s6 + $0x60] sm:$0xff]  }
 0x901   :  { %v857_v12 = vmul.f32 %v855_v30, %v849_v25  ;;  %v856_v33 = vmul.f32 %v852_v31, %v852_v31 }
 0x903   :  { %v859_v34 = vmul.f32 0.044715, %v857_v12  ;;  %v858_v35 = vmul.f32 %v856_v33, %v852_v31  ;;  %v2328_v12 = vld [vmem:[%s3093_s6 + $0x48] sm:$0xff]  }
 0x904   :  { %v2329_v33 = vld [vmem:[%s3093_s6 + $0x68] sm:$0xff]  }
 0x905   :  { %v861_v15 = vadd.f32 %v859_v34, %v849_v25  ;;  %v860_v36 = vmul.f32 0.044715, %v858_v35 }
 0x907   :  { %v863_v37 = vmul.f32 0.7978846, %v861_v15  ;;  %v862_v38 = vadd.f32 %v860_v36, %v852_v31 }
 0x909   :  { %2384 = vtanh.f32 %v863_v37  ;;  %v864_v39 = vmul.f32 0.7978846, %v862_v38 }
 0x90b   :  { %2386 = vtanh.f32 %v864_v39  ;;  %v2886_v39 = vld [vmem:[%s3094_s5 + $0x4] sm:$0xf] }
 0x913   :  { %v2385_v43 = vpop.eup %2384 }
 0x914   :  { %v867_v44 = vadd.f32 1.0, %v2385_v43  ;;  %v1009_v43 = vrot.slane %v2886_v39, %v2599_v41 }
 0x915   :  { %v2387_v45 = vpop.eup %2386 }
 0x916   :  { %v869_v47 = vmul.f32 0.5, %v867_v44  ;;  %v868_v49 = vadd.f32 1.0, %v2387_v45 }
 0x918   :  { %v870_v50 = vmul.f32 0.5, %v868_v49  ;;  %v871_v51 = vmul.f32 %v869_v47, %v849_v25 }
 0x91a   :  { %v872_v52 = vmul.f32 %v870_v50, %v852_v31  ;;  %v2326_v31 = vld [vmem:[%s3093_s6 + $0x40] sm:$0xff]  }
 0x91b   :  { %2216 = vmatpush3.bf16.msra.mxu0 %v2326_v31 }
 0x91c   :  { %v873_v55 = vpack.c.bf16 %v872_v52, %v871_v51  ;;  %2217 = vmatprep.subr.bf16.mxu0 %v2450_v0  ;;  %v1015_v51 = vrot.slane %v2886_v39, %v2609_v46 }
 0x91e   :  { %2212 = vmatmul.mubr.msk.bf16.vlgmr.msra.gmra.mrb[20].mxu1 %vm906_vm5, %v873_v55 }
 0x91f   :  { %2235 = vmatprep.mubr.msk.bf16.mxu1 %vm2451_vm0, %v2450_v0  ;;  %2232 = vmatpush3.bf16.msra.mxu1 %v2327_v32 }
 0x920   :  { %2233 = vmatprep.subr.bf16.mxu1 %v2450_v0  ;;  %2218 = vmatpush3.bf16.msra.mxu0 %v2328_v12 }
 0x921   :  { %2223 = vmatprep.subr.bf16.mxu0 %v2450_v0 }
 0x923   :  { %2234 = vmatpush3.bf16.msra.mxu1 %v2329_v33 }
 0x9f1   :  { %v944_v3 = vpop.f32.mrb[20].mxu1 }
 0x9f2   :  { %v951_v59 = vadd.f32 %v944_v3, %v2800_v23  ;;  %v2213_v4 = vpop.f32.mrb[21].mxu1  ;;  %v2330_v3 = vld [vmem:[%s3093_s6 + $0x50] sm:$0xff]  }
 0x9f3   :  { %v947_v62 = vpop.f32.mrb[22].mxu1  ;;  %v2331_v4 = vld [vmem:[%s3093_s6 + $0x58] sm:$0xff]  }
 0x9f4   :  { %v2855_v9 = vadd.f32 %v956_v61, %v951_v59  ;;  %v952_v2 = vadd.f32 %v947_v62, %v2803_v28  ;;  %v2214_v17 = vpop.f32.mrb[23].mxu1  ;;  %v2907_v62 = vld [vmem:[%s3095_s7 + $0x8] sm:$0x1f] }
 0x9f6   :  { %v2858_v19 = vadd.f32 %v956_v61, %v952_v2  ;;  %v980_v42 = vsel %vm167_vm3, %v2855_v9, 0.0  ;;  %v1022_v2 = vrot.slane %v2907_v62, %v2599_v41 }
 0x9f7   :  { %981 = vadd.xlane.f32.xlu0 %v980_v42  ;;  %v1139_v42 = vrot.slane %v2907_v62, %v2631_v58 }
 0x9f8   :  { %v983_v20 = vsel %vm167_vm3, %v2858_v19, 0.0 }
 0x9f9   :  { %984 = vadd.xlane.f32.xlu1 %v983_v20 }
 0xa84   :  { %v982_v57 = vpop.xlane.xlu0 %981 }
 0xa85   :  { %v986_v16 = vmul.f32 0.03125, %v982_v57 }
 0xa86   :  { %v985_v23 = vpop.xlane.xlu1 %984 }
 0xa87   :  { %v988_v8 = vsub.f32 %v2855_v9, %v986_v16  ;;  %v987_v24 = vmul.f32 0.03125, %v985_v23 }
 0xa89   :  { %v989_v25 = vsub.f32 %v2858_v19, %v987_v24  ;;  %v990_v28 = vmul.f32 %v988_v8, %v988_v8 }
 0xa8b   :  { %v992_v26 = vsel %vm167_vm3, %v990_v28, 0.0  ;;  %v991_v29 = vmul.f32 %v989_v25, %v989_v25 }
 0xa8c   :  { %993 = vadd.xlane.f32.xlu0 %v992_v26 }
 0xa8d   :  { %v995_v30 = vsel %vm167_vm3, %v991_v29, 0.0 }
 0xa8e   :  { %996 = vadd.xlane.f32.xlu1 %v995_v30 }
 0xb19   :  { %v994_v34 = vpop.xlane.xlu0 %993 }
 0xb1a   :  { %v998_v35 = vmul.f32 0.03125, %v994_v34 }
 0xb1b   :  { %v997_v15 = vpop.xlane.xlu1 %996 }
 0xb1c   :  { %v1000_v36 = vadd.f32 1e-05, %v998_v35  ;;  %v999_v37 = vmul.f32 0.03125, %v997_v15 }
 0xb1e   :  { %2388 = vrsqrt.f32 %v1000_v36  ;;  %v1001_v38 = vadd.f32 1e-05, %v999_v37  ;;  %v1082_v37 = vrot.slane %v2907_v62, %v2609_v46 }
 0xb20   :  { %2390 = vrsqrt.f32 %v1001_v38 }
 0xb28   :  { %v2389_v44 = vpop.eup %2388 }
 0xb29   :  { %v1004_v45 = vmul.f32 %v2389_v44, %v988_v8 }
 0xb2a   :  { %v2391_v47 = vpop.eup %2390 }
 0xb2b   :  { %v1010_v49 = vmul.f32 %v1009_v43, %v1004_v45  ;;  %v1005_v50 = vmul.f32 %v2391_v47, %v989_v25 }
 0xb2d   :  { %v1011_v52 = vmul.f32 %v1009_v43, %v1005_v50  ;;  %v1016_v55 = vadd.f32 %v1015_v51, %v1010_v49 }
 0xb2f   :  { %v1017_v61 = vadd.f32 %v1015_v51, %v1011_v52 }
 0xb31   :  { %v1018_v59 = vpack.c.bf16 %v1017_v61, %v1016_v55 }
 0xb33   :  { %2220 = vmatmul.mubr.msk.bf16.vlgmr.msra.gmra.mrb[20].mxu0 %vm167_vm3, %v1018_v59  ;;  %2236 = vmatmul.mubr.msk.bf16.vlgmr.msra.gmra.mrb[24].mxu1 %vm167_vm3, %v1018_v59 }
 0xb34   :  { %2224 = vmatpush3.bf16.msra.mxu0 %v2330_v3  ;;  %2227 = vmatprep.mubr.msk.bf16.mxu0 %vm2451_vm0, %v2450_v0 }
 0xb35   :  { %2225 = vmatprep.subr.bf16.mxu0 %v2450_v0 }
 0xb38   :  { %2226 = vmatpush3.bf16.msra.mxu0 %v2331_v4 }
 0xb3b   :  { %2228 = vmatmul.mubr.msk.bf16.vlgmr.msra.gmra.mrb[24].mxu0 %vm167_vm3, %v1018_v59 }
 0xc06   :  { %v1072_v17 = vpop.f32.mrb[20].mxu0  ;;  %v1186_v20 = vpop.f32.mrb[24].mxu1 }
 0xc07   :  { %v1073_v57 = vadd.f32 %v1072_v17, %v1022_v2  ;;  %v2221_v16 = vpop.f32.mrb[21].mxu0  ;;  %v2237_v23 = vpop.f32.mrb[25].mxu1  ;;  %v1187_v26 = vadd.f32 %v1186_v20, %v1139_v42 }
 0xc08   :  { %v1075_v8 = vpop.f32.mrb[22].mxu0  ;;  %v1189_v24 = vpop.f32.mrb[26].mxu1 }
 0xc09   :  { %v2222_v25 = vpop.f32.mrb[23].mxu0  ;;  %v2238_v28 = vpop.f32.mrb[27].mxu1  ;;  %v1076_v29 = vadd.f32 %v1075_v8, %v1022_v2  ;;  %v1190_v30 = vadd.f32 %v1189_v24, %v1139_v42  ;;  %v1193_v31 = vmul.f32 %v1073_v57, %v2640_v63  ;;  %v1195_v32 = vmul.f32 %v1073_v57, %v2645_v1 }
 0xc0a   :  { %v1197_v41 = vmul.f32 %v1073_v57, %v2650_v5  ;;  %v1199_v12 = vmul.f32 %v1073_v57, %v2655_v6 }
 0xc0b   :  { %v1194_v33 = vmul.f32 %v1076_v29, %v2660_v7  ;;  %v1196_v34 = vmul.f32 %v1076_v29, %v2665_v10  ;;  %v1198_v35 = vmul.f32 %v1076_v29, %v2670_v11  ;;  %v1200_v15 = vmul.f32 %v1076_v29, %v2675_v13 }
 0xc0c   :  { %v1394_v36 = vpack.c.bf16 %v1190_v30, %v1187_v26 }
 0xc0d   :  { %v1202_v38 = vpack.c.bf16 %v1196_v34, %v1195_v32  ;;  %v1201_v43 = vpack.c.bf16 %v1194_v33, %v1193_v31  ;;  %v1203_v1 = vpack.c.bf16 %v1198_v35, %v1197_v41  ;;  %v1204_v44 = vpack.c.bf16 %v1200_v15, %v1199_v12 }
 0xc0e   :  { %v1129_v63 = vpop.f32.mrb[24].mxu0  ;;  %2249 = vmatprep.subr.bf16.mxu1 %v1394_v36 }
 0xc0f   :  { %v2229_v5 = vpop.f32.mrb[25].mxu0  ;;  %2250 = vmatpush3.bf16.msra.mxu1 %v1394_v36  ;;  %2241 = vmatprep.mubr.msk.bf16.mxu0 %vm167_vm3, %v1201_v43  ;;  %v1130_v7 = vadd.f32 %v1129_v63, %v1082_v37 }
 0xc10   :  { %v1132_v6 = vpop.f32.mrb[26].mxu0  ;;  %2267 = vmatprep.subr.bf16.mxu1 %v2450_v0 }
 0xc11   :  { %v1133_v10 = vadd.f32 %v1132_v6, %v1082_v37  ;;  %v2230_v11 = vpop.f32.mrb[27].mxu0 }
 0xc13   :  { %v1205_v13 = vpack.c.bf16 %v1133_v10, %v1130_v7 }
 0xc15   :  { %2304 = vmatprep.subr.msk.bf16.mxu0 %vm167_vm3, %v1205_v13  ;;  %v1219_v46 = vsel %vm167_vm3, %v1205_v13, 0 }
 0xc16   :  { %2240 = vmatpush3.bf16.xpose.msra.mxu0 %v1219_v46 }
 0xc17   :  { %2259 = vmatprep.subr.bf16.mxu0 %v2450_v0 }
 0xc1d   :  { %2242 = vmatmul.mubr.msk.bf16.vlgmr.msra.gmra.mrb[28].mxu0 %vm167_vm3, %v1202_v38 }
 0xc1e   :  { %2245 = vmatprep.mubr.msk.bf16.mxu0 %vm167_vm3, %v1203_v1 }
 0xc25   :  { %2246 = vmatmul.mubr.msk.bf16.gmra.mrb[32].mxu0 %vm167_vm3, %v1204_v44 }
 0xc26   :  { %2263 = vmatprep.mubr.msk.bf16.mxu0 %vm2451_vm0, %v2450_v0 }
 0xcf0   :  { %v2243_v45 = vpop.f32.mrb[28].mxu0 }
 0xcf1   :  { %v1255_v47 = vpop.f32.mrb[29].mxu0  ;;  %v1288_v49 = vmul.f32 0.35355338, %v2243_v45 }
 0xcf2   :  { %v1286_v50 = vmul.f32 0.35355338, %v1255_v47  ;;  %v2244_v51 = vpop.f32.mrb[30].mxu0 }
 0xcf3   :  { %v1258_v52 = vpop.f32.mrb[31].mxu0  ;;  %v1289_v55 = vmul.f32 0.35355338, %v2244_v51  ;;  %v1296_v2 = vadd.f32 %v1288_v49, %v2710_v54 }
 0xcf4   :  { %v1287_v61 = vmul.f32 0.35355338, %v1258_v52  ;;  %v1294_v3 = vadd.f32 %v1286_v50, %v2700_v48 }
 0xcf5   :  { %v1297_v20 = vadd.f32 %v1289_v55, %v2716_v60  ;;  %v1308_v24 = vsel %vm491_vm4, %v1296_v2, -inf }
 0xcf6   :  { %v1302_v59 = vsel %vm491_vm4, %v1294_v3, -inf  ;;  %v1295_v4 = vadd.f32 %v1287_v61, %v2705_v53 }
 0xcf7   :  { %1303 = vmax.xlane.f32.xlu0 %v1302_v59  ;;  %v1311_v53 = vsel %vm491_vm4, %v1297_v20, -inf }
 0xcf8   :  { %v2247_v17 = vpop.f32.mrb[32].mxu0  ;;  %v1305_v42 = vsel %vm491_vm4, %v1295_v4, -inf }
 0xcf9   :  { %1306 = vmax.xlane.f32.xlu1 %v1305_v42  ;;  %v1271_v57 = vpop.f32.mrb[33].mxu0  ;;  %v1292_v16 = vmul.f32 0.35355338, %v2247_v17 }
 0xcfa   :  { %v1290_v23 = vmul.f32 0.35355338, %v1271_v57  ;;  %v2248_v8 = vpop.f32.mrb[34].mxu0 }
 0xcfb   :  { %1309 = vmax.xlane.f32.xlu0 %v1308_v24  ;;  %v1274_v48 = vpop.f32.mrb[35].mxu0  ;;  %v1293_v25 = vmul.f32 0.35355338, %v2248_v8  ;;  %v1300_v29 = vadd.f32 %v1292_v16, %v2737_v22 }
 0xcfc   :  { %v1291_v28 = vmul.f32 0.35355338, %v1274_v48  ;;  %v1298_v54 = vadd.f32 %v1290_v23, %v2726_v14 }
 0xcfd   :  { %1312 = vmax.xlane.f32.xlu1 %v1311_v53  ;;  %v1301_v31 = vadd.f32 %v1293_v25, %v2744_v27  ;;  %v1320_v32 = vsel %vm491_vm4, %v1300_v29, -inf }
 0xcfe   :  { %v1314_v26 = vsel %vm491_vm4, %v1298_v54, -inf  ;;  %v1299_v60 = vadd.f32 %v1291_v28, %v2732_v21 }
 0xcff   :  { %1315 = vmax.xlane.f32.xlu0 %v1314_v26  ;;  %v1323_v41 = vsel %vm491_vm4, %v1301_v31, -inf }
 0xd00   :  { %v1317_v30 = vsel %vm491_vm4, %v1299_v60, -inf }
 0xd01   :  { %1318 = vmax.xlane.f32.xlu1 %v1317_v30 }
 0xd03   :  { %1321 = vmax.xlane.f32.xlu0 %v1320_v32 }
 0xd05   :  { %1324 = vmax.xlane.f32.xlu1 %v1323_v41 }
 0xd84   :  { %v1304_v14 = vpop.xlane.xlu0 %1303 }
 0xd85   :  { %v1326_v12 = vsub.f32 %v1294_v3, %v1304_v14 }
 0xd86   :  { %v1307_v33 = vpop.xlane.xlu1 %1306 }
 0xd87   :  { %v1334_v34 = vmul.f32 1.442695, %v1326_v12  ;;  %v1327_v35 = vsub.f32 %v1295_v4, %v1307_v33 }
 0xd88   :  { %v1310_v21 = vpop.xlane.xlu0 %1309 }
 0xd89   :  { %2392 = vpow2.f32 %v1334_v34  ;;  %v1336_v22 = vmul.f32 1.442695, %v1327_v35  ;;  %v1328_v15 = vsub.f32 %v1296_v2, %v1310_v21 }
 0xd8a   :  { %v1313_v36 = vpop.xlane.xlu1 %1312 }
 0xd8b   :  { %2394 = vpow2.f32 %v1336_v22  ;;  %v1338_v37 = vmul.f32 1.442695, %v1328_v15  ;;  %v1329_v27 = vsub.f32 %v1297_v20, %v1313_v36 }
 0xd8c   :  { %v1316_v38 = vpop.xlane.xlu0 %1315 }
 0xd8d   :  { %2396 = vpow2.f32 %v1338_v37  ;;  %v1340_v63 = vmul.f32 1.442695, %v1329_v27  ;;  %v1330_v43 = vsub.f32 %v1298_v54, %v1316_v38 }
 0xd8e   :  { %v1319_v1 = vpop.xlane.xlu1 %1318 }
 0xd8f   :  { %2398 = vpow2.f32 %v1340_v63  ;;  %v1342_v44 = vmul.f32 1.442695, %v1330_v43  ;;  %v1331_v5 = vsub.f32 %v1299_v60, %v1319_v1  ;;  %v2332_v43 = vld [vmem:[%s3093_s6 + $0x70] sm:$0xff]   ;;  %v2333_v1 = vld [vmem:[%s3093_s6 + $0x78] sm:$0xff]  }
 0xd90   :  { %v1322_v6 = vpop.xlane.xlu0 %1321  ;;  %2260 = vmatpush3.bf16.msra.mxu0 %v2332_v43 }
 0xd91   :  { %2400 = vpow2.f32 %v1342_v44  ;;  %v1344_v7 = vmul.f32 1.442695, %v1331_v5  ;;  %v1332_v10 = vsub.f32 %v1300_v29, %v1322_v6  ;;  %2261 = vmatprep.subr.bf16.mxu0 %v2450_v0  ;;  %v2442_v5 = vld [vmem:[%s3096_s3 + $0x10] sm:$0xff] }
 0xd92   :  { %v1325_v11 = vpop.xlane.xlu1 %1324 }
 0xd93   :  { %v2393_v13 = vpop.eup %2392  ;;  %2402 = vpow2.f32 %v1344_v7  ;;  %v1346_v46 = vmul.f32 1.442695, %v1332_v10  ;;  %v1333_v45 = vsub.f32 %v1301_v31, %v1325_v11  ;;  %v2443_v10 = vld [vmem:[%s3096_s3] sm:$0xff] }
 0xd94   :  { %v1350_v47 = vsel %vm491_vm4, %v2393_v13, 0.0  ;;  %2262 = vmatpush3.bf16.msra.mxu0 %v2333_v1 }
 0xd95   :  { %v2395_v49 = vpop.eup %2394  ;;  %2404 = vpow2.f32 %v1346_v46  ;;  %v1348_v50 = vmul.f32 1.442695, %v1333_v45  ;;  %1351 = vadd.xlane.f32.xlu0 %v1350_v47  ;;  %2275 = vmatprep.subr.bf16.mxu0 %v2450_v0  ;;  %v2444_v45 = vld [vmem:[%s3096_s3 + $0x18] sm:$0xff] }
 0xd96   :  { %v1353_v51 = vsel %vm491_vm4, %v2395_v49, 0.0 }
 0xd97   :  { %v2397_v52 = vpop.eup %2396  ;;  %2406 = vpow2.f32 %v1348_v50  ;;  %1354 = vadd.xlane.f32.xlu1 %v1353_v51  ;;  %v2445_v51 = vld [vmem:[%s3096_s3 + $0x8] sm:$0xff] }
 0xd98   :  { %v1356_v55 = vsel %vm491_vm4, %v2397_v52, 0.0 }
 0xd99   :  { %v2399_v61 = vpop.eup %2398  ;;  %1357 = vadd.xlane.f32.xlu0 %v1356_v55 }
 0xd9a   :  { %v1359_v3 = vsel %vm491_vm4, %v2399_v61, 0.0 }
 0xd9b   :  { %v2401_v59 = vpop.eup %2400  ;;  %1360 = vadd.xlane.f32.xlu1 %v1359_v3 }
 0xd9c   :  { %v1362_v4 = vsel %vm491_vm4, %v2401_v59, 0.0 }
 0xd9d   :  { %v2403_v2 = vpop.eup %2402  ;;  %1363 = vadd.xlane.f32.xlu0 %v1362_v4 }
 0xd9e   :  { %v1365_v17 = vsel %vm491_vm4, %v2403_v2, 0.0 }
 0xd9f   :  { %v2405_v42 = vpop.eup %2404  ;;  %1366 = vadd.xlane.f32.xlu1 %v1365_v17  ;;  %v2446_v17 = vld [vmem:[%s3096_s3 + $0x30] sm:$0xff] }
 0xda0   :  { %v1368_v20 = vsel %vm491_vm4, %v2405_v42, 0.0 }
 0xda1   :  { %v2407_v57 = vpop.eup %2406  ;;  %1369 = vadd.xlane.f32.xlu0 %v1368_v20  ;;  %v2447_v20 = vld [vmem:[%s3096_s3 + $0x20] sm:$0xff] }
 0xda2   :  { %v1371_v16 = vsel %vm491_vm4, %v2407_v57, 0.0 }
 0xda3   :  { %1372 = vadd.xlane.f32.xlu1 %v1371_v16 }
 0xe22   :  { %v1352_v23 = vpop.xlane.xlu0 %1351 }
 0xe23   :  { %2408 = vrcp.f32 %v1352_v23 }
 0xe24   :  { %v1355_v8 = vpop.xlane.xlu1 %1354 }
 0xe25   :  { %2410 = vrcp.f32 %v1355_v8 }
 0xe26   :  { %v1358_v24 = vpop.xlane.xlu0 %1357 }
 0xe27   :  { %2412 = vrcp.f32 %v1358_v24  ;;  %v2448_v24 = vld [vmem:[%s3096_s3 + $0x38] sm:$0xff] }
 0xe28   :  { %v1361_v48 = vpop.xlane.xlu1 %1360 }
 0xe29   :  { %2414 = vrcp.f32 %v1361_v48 }
 0xe2a   :  { %v1364_v25 = vpop.xlane.xlu0 %1363 }
 0xe2b   :  { %2416 = vrcp.f32 %v1364_v25  ;;  %v2449_v25 = vld [vmem:[%s3096_s3 + $0x28] sm:$0xff] }
 0xe2c   :  { %v1367_v28 = vpop.xlane.xlu1 %1366 }
 0xe2d   :  { %v2409_v53 = vpop.eup %2408  ;;  %2418 = vrcp.f32 %v1367_v28 }
 0xe2e   :  { %v1370_v54 = vpop.xlane.xlu0 %1369  ;;  %v1382_v29 = vmul.f32 %v2409_v53, %v2393_v13 }
 0xe2f   :  { %v2411_v26 = vpop.eup %2410  ;;  %2420 = vrcp.f32 %v1370_v54 }
 0xe30   :  { %v1373_v60 = vpop.xlane.xlu1 %1372  ;;  %v1383_v30 = vmul.f32 %v2411_v26, %v2395_v49 }
 0xe31   :  { %v2413_v31 = vpop.eup %2412  ;;  %2422 = vrcp.f32 %v1373_v60 }
 0xe32   :  { %v1390_v32 = vpack.c.bf16 %v1383_v30, %v1382_v29  ;;  %v1384_v14 = vmul.f32 %v2413_v31, %v2397_v52 }
 0xe33   :  { %v2415_v41 = vpop.eup %2414 }
 0xe34   :  { %v1385_v12 = vmul.f32 %v2415_v41, %v2399_v61  ;;  %2251 = vmatprep.mubr.msk.bf16.mxu1 %vm491_vm4, %v1390_v32  ;;  %v1556_v41 = vrot.slane %v2907_v62, %v2795_v18 }
 0xe35   :  { %v2417_v33 = vpop.eup %2416 }
 0xe36   :  { %v1391_v34 = vpack.c.bf16 %v1385_v12, %v1384_v14  ;;  %v1386_v21 = vmul.f32 %v2417_v33, %v2401_v59 }
 0xe37   :  { %v2419_v35 = vpop.eup %2418 }
 0xe38   :  { %2252 = vmatmul.mubr.msk.bf16.vlgmr.msra.gmra.mrb[28].mxu1 %vm491_vm4, %v1391_v34  ;;  %v1387_v22 = vmul.f32 %v2419_v35, %v2403_v2 }
 0xe39   :  { %v2421_v15 = vpop.eup %2420 }
 0xe3a   :  { %v1392_v36 = vpack.c.bf16 %v1387_v22, %v1386_v21  ;;  %v1388_v27 = vmul.f32 %v2421_v15, %v2405_v42 }
 0xe3b   :  { %v2423_v37 = vpop.eup %2422 }
 0xe3c   :  { %2255 = vmatprep.mubr.msk.bf16.mxu1 %vm491_vm4, %v1392_v36  ;;  %v1389_v38 = vmul.f32 %v2423_v37, %v2407_v57 }
 0xe3e   :  { %v1393_v63 = vpack.c.bf16 %v1389_v38, %v1388_v27 }
 0xe40   :  { %2256 = vmatmul.mubr.msk.bf16.gmra.mrb[32].mxu1 %vm491_vm4, %v1393_v63 }
 0xe41   :  { %2271 = vmatprep.mubr.msk.bf16.mxu1 %vm2451_vm0, %v2450_v0 }
 0xf0b   :  { %v2253_v44 = vpop.f32.mrb[28].mxu1 }
 0xf0c   :  { %v1474_v6 = vmul.f32 %v2442_v5, %v2253_v44  ;;  %v1441_v7 = vpop.f32.mrb[29].mxu1 }
 0xf0d   :  { %v1472_v11 = vmul.f32 %v2443_v10, %v1441_v7  ;;  %v2254_v13 = vpop.f32.mrb[30].mxu1  ;;  %v2334_v7 = vld [vmem:[%s3098_s8 + $0x10] sm:$0xff]   ;;  %v2335_v10 = vld [vmem:[%s3098_s8 + $0x18] sm:$0xff]  }
 0xf0e   :  { %v1481_v46 = vsel %vm167_vm3, %v1474_v6, 0.0  ;;  %v1475_v47 = vmul.f32 %v2444_v45, %v2254_v13  ;;  %v1444_v49 = vpop.f32.mrb[31].mxu1  ;;  %2268 = vmatpush3.bf16.msra.mxu1 %v2334_v7 }
 0xf0f   :  { %v1480_v50 = vsel %vm167_vm3, %v1472_v11, 0.0  ;;  %v1473_v52 = vmul.f32 %v2445_v51, %v1444_v49  ;;  %2269 = vmatprep.subr.bf16.mxu1 %v2450_v0 }
 0xf10   :  { %v1482_v55 = vadd.f32 %v1481_v46, %v1480_v50  ;;  %v1488_v61 = vsel %vm167_vm3, %v1475_v47, 0.0  ;;  %v1588_v50 = vrot.slane %v2886_v39, %v2631_v58  ;;  %v2336_v58 = vld [vmem:[%s3099_s10 + $0x20] sm:$0xff]  }
 0xf11   :  { %v1487_v3 = vsel %vm167_vm3, %v1473_v52, 0.0 }
 0xf12   :  { %v1489_v59 = vadd.f32 %v1488_v61, %v1487_v3  ;;  %2270 = vmatpush3.bf16.msra.mxu1 %v2335_v10  ;;  %v1594_v61 = vrot.slane %v2886_v39, %v2795_v18  ;;  %v2337_v18 = vld [vmem:[%s3099_s10 + $0x28] sm:$0xff]   ;;  %v2338_v39 = vld [vmem:[%s3099_s10 + $0x30] sm:$0xff]  }
 0xf13   :  { %v2257_v4 = vpop.f32.mrb[32].mxu1  ;;  %2287 = vmatprep.subr.bf16.mxu1 %v2450_v0 }
 0xf14   :  { %v1457_v2 = vpop.f32.mrb[33].mxu1  ;;  %v1478_v42 = vmul.f32 %v2446_v17, %v2257_v4 }
 0xf15   :  { %v1476_v57 = vmul.f32 %v2447_v20, %v1457_v2  ;;  %v2258_v16 = vpop.f32.mrb[34].mxu1  ;;  %v2339_v20 = vld [vmem:[%s3099_s10 + $0x38] sm:$0xff]  }
 0xf16   :  { %v1460_v23 = vpop.f32.mrb[35].mxu1  ;;  %v1479_v48 = vmul.f32 %v2448_v24, %v2258_v16  ;;  %v1485_v54 = vsel %vm167_vm3, %v1478_v42, 0.0 }
 0xf17   :  { %v1483_v8 = vsel %vm167_vm3, %v1476_v57, 0.0  ;;  %v1477_v28 = vmul.f32 %v2449_v25, %v1460_v23  ;;  %v2034_v57 = vld [vmem:[%s3100_s9 + $0x1] ss:$0 sm:$0xff] }
 0xf18   :  { %v1484_v53 = vadd.f32 %v1483_v8, %v1482_v55  ;;  %v1492_v30 = vsel %vm167_vm3, %v1479_v48, 0.0 }
 0xf19   :  { %v1490_v26 = vsel %vm167_vm3, %v1477_v28, 0.0 }
 0xf1a   :  { %v1486_v60 = vadd.f32 %v1485_v54, %v1484_v53  ;;  %v1491_v29 = vadd.f32 %v1490_v26, %v1489_v59 }
 0xf1c   :  { %v1493_v31 = vadd.f32 %v1492_v30, %v1491_v29 }
 0xf1e   :  { %v1494_v32 = vpack.c.bf16 %v1493_v31, %v1486_v60 }
 0xf20   :  { %2264 = vmatmul.mubr.msk.bf16.vlgmr.msra.gmra.mrb[36].mxu0 %vm167_vm3, %v1494_v32 }
 0xf21   :  { %2283 = vmatprep.mubr.msk.bf16.mxu0 %vm2451_vm0, %v2450_v0  ;;  %2276 = vmatpush3.bf16.msra.mxu0 %v2336_v58 }
 0xf22   :  { %2277 = vmatprep.subr.bf16.mxu0 %v2450_v0 }
 0xf25   :  { %2278 = vmatpush3.bf16.msra.mxu0 %v2337_v18 }
 0xf26   :  { %2279 = vmatprep.subr.bf16.mxu0 %v2450_v0 }
 0xf29   :  { %2280 = vmatpush3.bf16.msra.mxu0 %v2338_v39 }
 0xf2a   :  { %2281 = vmatprep.subr.bf16.mxu0 %v2450_v0 }
 0xf2d   :  { %2282 = vmatpush3.bf16.msra.mxu0 %v2339_v20  ;;  %v2056_v20 = vld [vmem:[%s3104_s14] ss:$0 sm:$0xff] }
 0xff3   :  { %v1544_v14 = vpop.f32.mrb[36].mxu0 }
 0xff4   :  { %v1551_v12 = vadd.f32 %v1544_v14, %v2855_v9  ;;  %v2265_v33 = vpop.f32.mrb[37].mxu0 }
 0xff5   :  { %v1547_v34 = vpop.f32.mrb[38].mxu0 }
 0xff6   :  { %v3009_v35 = vadd.f32 %v1556_v41, %v1551_v12  ;;  %v1552_v21 = vadd.f32 %v1547_v34, %v2858_v19  ;;  %v2266_v22 = vpop.f32.mrb[39].mxu0 }
 0xff8   :  { %v3012_v15 = vadd.f32 %v1556_v41, %v1552_v21  ;;  %v1559_v36 = vsel %vm167_vm3, %v3009_v35, 0.0 }
 0xff9   :  { %1560 = vadd.xlane.f32.xlu0 %v1559_v36 }
 0xffa   :  { %v1562_v37 = vsel %vm167_vm3, %v3012_v15, 0.0 }
 0xffb   :  { %1563 = vadd.xlane.f32.xlu1 %v1562_v37 }
0x1086   :  { %v1561_v27 = vpop.xlane.xlu0 %1560 }
0x1087   :  { %v1565_v38 = vmul.f32 0.03125, %v1561_v27 }
0x1088   :  { %v1564_v9 = vpop.xlane.xlu1 %1563 }
0x1089   :  { %v1567_v63 = vsub.f32 %v3009_v35, %v1565_v38  ;;  %v1566_v43 = vmul.f32 0.03125, %v1564_v9  ;;  %v2340_v38 = vld [vmem:[%s3101_s11] sm:$0xff]   ;;  %v2341_v9 = vld [vmem:[%s3101_s11 + $0x8] sm:$0xff]  }
0x108b   :  { %v1568_v1 = vsub.f32 %v3012_v15, %v1566_v43  ;;  %v1569_v19 = vmul.f32 %v1567_v63, %v1567_v63 }
0x108d   :  { %v1571_v44 = vsel %vm167_vm3, %v1569_v19, 0.0  ;;  %v1570_v5 = vmul.f32 %v1568_v1, %v1568_v1 }
0x108e   :  { %1572 = vadd.xlane.f32.xlu0 %v1571_v44 }
0x108f   :  { %v1574_v6 = vsel %vm167_vm3, %v1570_v5, 0.0 }
0x1090   :  { %1575 = vadd.xlane.f32.xlu1 %v1574_v6 }
0x111b   :  { %v1573_v11 = vpop.xlane.xlu0 %1572 }
0x111c   :  { %v1577_v13 = vmul.f32 0.03125, %v1573_v11 }
0x111d   :  { %v1576_v46 = vpop.xlane.xlu1 %1575 }
0x111e   :  { %v1579_v45 = vadd.f32 1e-05, %v1577_v13  ;;  %v1578_v47 = vmul.f32 0.03125, %v1576_v46 }
0x1120   :  { %2424 = vrsqrt.f32 %v1579_v45  ;;  %v1580_v49 = vadd.f32 1e-05, %v1578_v47 }
0x1122   :  { %2426 = vrsqrt.f32 %v1580_v49 }
0x112a   :  { %v2425_v51 = vpop.eup %2424 }
0x112b   :  { %v1583_v52 = vmul.f32 %v2425_v51, %v1567_v63  ;;  %v1768_v63 = vrot.slane %v2907_v62, %v955_v56  ;;  %v2342_v56 = vld [vmem:[%s3102_s13] sm:$0xff]   ;;  %v2343_v62 = vld [vmem:[%s3102_s13 + $0x8] sm:$0xff]  }
0x112c   :  { %v2427_v55 = vpop.eup %2426 }
0x112d   :  { %v1589_v3 = vmul.f32 %v1588_v50, %v1583_v52  ;;  %v1584_v59 = vmul.f32 %v2427_v55, %v1568_v1 }
0x112f   :  { %v1590_v4 = vmul.f32 %v1588_v50, %v1584_v59  ;;  %v1595_v2 = vadd.f32 %v1594_v61, %v1589_v3 }
0x1131   :  { %v1596_v17 = vadd.f32 %v1594_v61, %v1590_v4 }
0x1133   :  { %v1597_v42 = vpack.c.bf16 %v1596_v17, %v1595_v2 }
0x1135   :  { %2272 = vmatmul.mubr.msk.bf16.vlgmr.msra.gmra.mrb[36].mxu1 %vm167_vm3, %v1597_v42 }
0x1136   :  { %2291 = vmatprep.mubr.msk.bf16.mxu1 %vm2451_vm0, %v2450_v0  ;;  %2288 = vmatpush3.bf16.msra.mxu1 %v2340_v38 }
0x1137   :  { %2289 = vmatprep.subr.bf16.mxu1 %v2450_v0 }
0x113a   :  { %2290 = vmatpush3.bf16.msra.mxu1 %v2341_v9 }
0x113b   :  { %2295 = vmatprep.subr.bf16.mxu1 %v2450_v0 }
0x1208   :  { %v1660_v16 = vpop.f32.mrb[36].mxu1 }
0x1209   :  { %v1661_v23 = vadd.f32 %v2034_v57, %v1660_v16  ;;  %v2273_v8 = vpop.f32.mrb[37].mxu1 }
0x120a   :  { %v1663_v24 = vpop.f32.mrb[38].mxu1 }
0x120b   :  { %v1667_v48 = vmul.f32 %v1661_v23, %v1661_v23  ;;  %v1664_v25 = vadd.f32 %v2034_v57, %v1663_v24  ;;  %v2274_v28 = vpop.f32.mrb[39].mxu1 }
0x120d   :  { %v1669_v53 = vmul.f32 %v1667_v48, %v1661_v23  ;;  %v1668_v54 = vmul.f32 %v1664_v25, %v1664_v25 }
0x120f   :  { %v1671_v26 = vmul.f32 0.044715, %v1669_v53  ;;  %v1670_v60 = vmul.f32 %v1668_v54, %v1664_v25 }
0x1211   :  { %v1673_v29 = vadd.f32 %v1671_v26, %v1661_v23  ;;  %v1672_v30 = vmul.f32 0.044715, %v1670_v60 }
0x1213   :  { %v1675_v31 = vmul.f32 0.7978846, %v1673_v29  ;;  %v1674_v32 = vadd.f32 %v1672_v30, %v1664_v25 }
0x1215   :  { %2428 = vtanh.f32 %v1675_v31  ;;  %v1676_v41 = vmul.f32 0.7978846, %v1674_v32 }
0x1217   :  { %2430 = vtanh.f32 %v1676_v41 }
0x121f   :  { %v2429_v14 = vpop.eup %2428 }
0x1220   :  { %v1679_v12 = vadd.f32 1.0, %v2429_v14 }
0x1221   :  { %v2431_v33 = vpop.eup %2430 }
0x1222   :  { %v1681_v34 = vmul.f32 0.5, %v1679_v12  ;;  %v1680_v21 = vadd.f32 1.0, %v2431_v33 }
0x1224   :  { %v1682_v22 = vmul.f32 0.5, %v1680_v21  ;;  %v1683_v36 = vmul.f32 %v1681_v34, %v1661_v23 }
0x1226   :  { %v1684_v37 = vmul.f32 %v1682_v22, %v1664_v25 }
0x1228   :  { %v1685_v27 = vpack.c.bf16 %v1684_v37, %v1683_v36 }
0x122a   :  { %2284 = vmatmul.mubr.msk.bf16.vlgmr.msra.gmra.mrb[40].mxu0 %vm906_vm5, %v1685_v27 }
0x12fd   :  { %v1756_v43 = vpop.f32.mrb[40].mxu0 }
0x12fe   :  { %v1763_v1 = vadd.f32 %v1756_v43, %v3009_v35  ;;  %v2285_v19 = vpop.f32.mrb[41].mxu0  ;;  %v2051_v35 = vld [vmem:[%s3103_s12] ss:$0 sm:$0xff] }
0x12ff   :  { %v1759_v44 = vpop.f32.mrb[42].mxu0 }
0x1300   :  { %v1769_v5 = vadd.f32 %v1768_v63, %v1763_v1  ;;  %v1764_v6 = vadd.f32 %v1759_v44, %v3012_v15  ;;  %v2286_v7 = vpop.f32.mrb[43].mxu0 }
0x1302   :  { %v1770_v10 = vadd.f32 %v1768_v63, %v1764_v6  ;;  %v1771_v11 = vpack.c.bf16 %v1769_v5, %v1769_v5 }
0x1304   :  { %v1772_v13 = vpack.c.bf16 %v1770_v10, %v1770_v10  ;;  %v1786_v45 = vunpack.c.l.b16 %v1771_v11 }
0x1306   :  { %v1787_v46 = vunpack.c.l.b16 %v1772_v13 }
0x1308   :  { %v1788_v47 = vrot.slane %v1787_v46, 7 }
0x130a   :  { %v1790_v49 = vsel %vm1789_vm6, %v1788_v47, %v1786_v45 }
0x130b   :  { %v1791_v40 = vpack.c.b16 %v1790_v49, %v1790_v49 }
0x130d   :  { %2292 = vmatmul.mubr.msk.bf16.vlgmr.msra.gmra.mrb[40].mxu1 %vm167_vm3, %v1791_v40 }
0x130e   :  { %2299 = vmatprep.mubr.msk.bf16.mxu1 %vm2451_vm0, %v2450_v0  ;;  %2296 = vmatpush3.bf16.msra.mxu1 %v2342_v56 }
0x130f   :  { %2297 = vmatprep.subr.bf16.mxu1 %v2450_v0 }
0x1312   :  { %2298 = vmatpush3.bf16.msra.mxu1 %v2343_v62 }
0x13e0   :  { %v1841_v15 = vpop.f32.mrb[40].mxu1 }
0x13e1   :  { %v1842_v50 = vadd.f32 %v2051_v35, %v1841_v15  ;;  %v2293_v51 = vpop.f32.mrb[41].mxu1 }
0x13e2   :  { %v1844_v52 = vpop.f32.mrb[42].mxu1 }
0x13e3   :  { %v2294_v55 = vpop.f32.mrb[43].mxu1  ;;  %v1853_v61 = vmul.f32 %v1842_v50, %v1842_v50  ;;  %v2055_v60 = vmul.f32 -1.442695, %v1842_v50 }
0x13e5   :  { %v1855_v3 = vsel %vm1854_vm7, %v1853_v61, 0.0  ;;  %v1861_v59 = vmul.f32 %v1853_v61, %v1842_v50 }
0x13e6   :  { %1856 = vadd.xlane.f32.xlu1 %v1855_v3 }
0x13e7   :  { %v1862_v4 = vmul.f32 0.044715, %v1861_v59 }
0x13e9   :  { %v1863_v2 = vadd.f32 %v1862_v4, %v1842_v50 }
0x13eb   :  { %v1864_v17 = vmul.f32 0.7978846, %v1863_v2 }
0x13ed   :  { %2432 = vtanh.f32 %v1864_v17 }
0x13f7   :  { %v2433_v0 = vpop.eup %2432 }
0x13f8   :  { %v1866_v42 = vadd.f32 1.0, %v2433_v0 }
0x13fa   :  { %v1867_v58 = vmul.f32 0.5, %v1866_v42 }
0x13fc   :  { %v1868_v18 = vmul.f32 %v1867_v58, %v1842_v50 }
0x13fe   :  { %v1869_v39 = vpack.c.bf16 %v1868_v18, %v1868_v18 }
0x1400   :  { %2300 = vmatmul.mubr.msk.bf16.vlgmr.msra.gmra.mrb[44].mxu1 %vm167_vm3, %v1869_v39 }
0x1473   :  { %v1857_v29 = vpop.xlane.xlu1 %1856 }
0x1474   :  { %v1858_v30 = vmax.f32 %v1857_v29, 1e-24 }
0x14d3   :  { %v1930_v57 = vpop.f32.mrb[44].mxu1 }
0x14d4   :  { %v1931_v16 = vadd.f32 %v2056_v20, %v1930_v57  ;;  %v2301_v23 = vpop.f32.mrb[45].mxu1 }
0x14d5   :  { %v1933_v8 = vpop.f32.mrb[46].mxu1 }
0x14d6   :  { %v2302_v24 = vpop.f32.mrb[47].mxu1  ;;  %v1936_v48 = vmul.f32 %v1931_v16, %v1931_v16 }
0x14d8   :  { %v1938_v25 = vsel %vm1937_vm8, %v1936_v48, 0.0 }
0x14d9   :  { %1939 = vadd.xlane.f32.xlu0 %v1938_v25 }
0x1566   :  { %v1940_v28 = vpop.xlane.xlu0 %1939 }
0x1567   :  { %v1941_v53 = vmax.f32 %v1940_v28, 1e-24 }
0x1569   :  { %2434 = vrsqrt.f32 %v1941_v53 }
0x156a   :  { %2436 = vpow2.f32 %v2055_v60 }
0x156b   :  { %2438 = vrsqrt.f32 %v1858_v30 }
0x1573   :  { %v2435_v54 = vpop.eup %2434 }
0x1574   :  { %v1943_v26 = vmul.f32 %v2435_v54, %v1931_v16  ;;  %v2437_v31 = vpop.eup %2436 }
0x1575   :  { %v1850_v32 = vadd.f32 1.0, %v2437_v31  ;;  %v2439_v41 = vpop.eup %2438 }
0x1576   :  { %1945 = vrot.lane.b32.xlu0 %v1943_v26, %s2452_s19  ;;  %v1860_v14 = vmul.f32 %v2439_v41, %v1842_v50 }
0x1577   :  { %2440 = vrcp.f32 %v1850_v32 }
0x1581   :  { %v2441_v12 = vpop.eup %2440 }
0x1582   :  { %v1948_v33 = vsel %vm167_vm3, %v1860_v14, %v2441_v12 }
0x15e8   :  { %v1946_v34 = vpop.permute.xlu0 %1945 }
0x15e9   :  { %v1950_v21 = vsel %vm1949_vm9, %v1948_v33, %v1946_v34 }
0x15ea   :  { %1952 = vst.msk [vmem:[%s3105_s15] sm:$0x3] %vm1951_vm10, %v1950_v21 }

</bundles_post_ra>
